<compile_context>
chip_gen: v5e
topology: v5e:2x2
jax: 0.10.0
libtpu: 0.0.40
codegen_flags: <defaults>
</compile_context>

<pallas_src>
import functools
import math

import jax
import jax.numpy as jnp
from jax import lax
from jax.experimental import pallas as pl
from jax.experimental.pallas import tpu as pltpu

_LN_EPS = 1e-5  # PyTorch TransformerEncoderLayer default layer_norm_eps


def _layernorm(x, gamma, beta):
    mean = jnp.mean(x, axis=-1, keepdims=True)
    var = jnp.mean(jnp.square(x - mean), axis=-1, keepdims=True)
    return (x - mean) * lax.rsqrt(var + _LN_EPS) * gamma + beta


def _transformer_layer_kernel(
    nhead,
    # ---- inputs ----
    x_ref, w_in_ref, b_in_ref, pe_ref,
    w_q_ref, b_q_ref, w_k_ref, b_k_ref, w_v_ref, b_v_ref,
    w_o_ref, b_o_ref, ln1_g_ref, ln1_b_ref,
    w_ff1_ref, b_ff1_ref, w_ff2_ref, b_ff2_ref, ln2_g_ref, ln2_b_ref,
    w_out_ref, b_out_ref,
    # ---- outputs ----
    out_ref,
    # ---- scratch ----
    h_ref,
):
    """One encoder layer per grid step; grid = (batch_blocks, num_layers).

    x_ref : (Bt, T, D_in)         current batch block
    *_ref : current layer's weights (layer axis squeezed out by BlockSpec)
    out_ref: (Bt, output_dim)     written only on the last layer step
    h_ref : (Bt*T, d_model) VMEM scratch carrying the hidden state across layers
    """
    l = pl.program_id(1)
    num_layers = pl.num_programs(1)

    Bt, T, D_in = x_ref.shape
    D = h_ref.shape[-1]
    hd = D // nhead
    scale = 1.0 / math.sqrt(hd)

    # ---- input projection + positional encoding (only on the first layer step)
    @pl.when(l == 0)
    def _():
        x = x_ref[...].reshape(Bt * T, D_in)
        h0 = jnp.dot(x, w_in_ref[...], preferred_element_type=jnp.float32)
        h_ref[...] = h0 + b_in_ref[...] + pe_ref[...]

    h = h_ref[...]                                                 # (Bt*T, D)

    # ---- multi-head self-attention (post-norm encoder layer) ----
    q = jnp.dot(h, w_q_ref[...], preferred_element_type=jnp.float32) + b_q_ref[...]
    k = jnp.dot(h, w_k_ref[...], preferred_element_type=jnp.float32) + b_k_ref[...]
    v = jnp.dot(h, w_v_ref[...], preferred_element_type=jnp.float32) + b_v_ref[...]

    # Out-projection folded per head: concat(ctx_h) @ W_oT == sum_h ctx_h @ W_oT[rows_h].
    attn = b_o_ref[...]                                            # (1, D) broadcast
    for hh in range(nhead):                                        # static unroll
        lo = hh * hd
        qh = q[:, lo:lo + hd].reshape(Bt, T, hd)                   # major-dim split only
        kh = k[:, lo:lo + hd].reshape(Bt, T, hd)
        vh = v[:, lo:lo + hd].reshape(Bt, T, hd)
        # scores: batched over the Bt samples, contract head_dim (no transpose)
        s = lax.dot_general(qh, kh, (((2,), (2,)), ((0,), (0,))),
                            preferred_element_type=jnp.float32) * scale   # (Bt, T, T)
        s = s - jnp.max(s, axis=-1, keepdims=True)
        p = jnp.exp(s)
        p = p * pl.reciprocal(jnp.sum(p, axis=-1, keepdims=True))   # EUP reciprocal
        ctx = lax.dot_general(p, vh, (((2,), (1,)), ((0,), (0,))),
                              preferred_element_type=jnp.float32)   # (Bt, T, hd)
        attn = attn + jnp.dot(ctx.reshape(Bt * T, hd), w_o_ref[lo:lo + hd, :],
                              preferred_element_type=jnp.float32)

    h = _layernorm(h + attn, ln1_g_ref[...], ln1_b_ref[...])

    # ---- feed-forward (ReLU), post-norm residual ----
    ff = jnp.maximum(
        jnp.dot(h, w_ff1_ref[...], preferred_element_type=jnp.float32) + b_ff1_ref[...],
        0.0)
    ff = jnp.dot(ff, w_ff2_ref[...], preferred_element_type=jnp.float32) + b_ff2_ref[...]
    h = _layernorm(h + ff, ln2_g_ref[...], ln2_b_ref[...])
    h_ref[...] = h

    # ---- last timestep -> dropout (identity at eval) -> output Linear ----
    @pl.when(l == num_layers - 1)
    def _():
        h3 = h.reshape(Bt, T, D)
        last = lax.slice_in_dim(h3, T - 1, T, axis=1).reshape(Bt, D)   # (Bt, D)
        out_ref[...] = (jnp.dot(last, w_out_ref[...],
                                preferred_element_type=jnp.float32)
                        + b_out_ref[...])                              # (Bt, O) lane-dense


def positional_encoding(seq_len, d_model):
    """Same math as the PyTorch PositionalEncoding buffer (rows :seq_len)."""
    position = jnp.arange(seq_len, dtype=jnp.float32)[:, None]
    div_term = jnp.exp(jnp.arange(0, d_model, 2, dtype=jnp.float32)
                       * (-math.log(10000.0) / d_model))
    pe = jnp.zeros((seq_len, d_model), jnp.float32)
    pe = pe.at[:, 0::2].set(jnp.sin(position * div_term))
    pe = pe.at[:, 1::2].set(jnp.cos(position * div_term))
    return pe


def init_transformer_params(key, input_dim, d_model, nhead, num_layers, output_dim):
    """Deterministic params, PyTorch-style uniform(-1/sqrt(fan_in), 1/sqrt(fan_in))."""
    def uni(k, shape, fan_in):
        bound = 1.0 / math.sqrt(fan_in)
        return jax.random.uniform(k, shape, jnp.float32, -bound, bound)

    d_ff = 4 * d_model
    params = {}
    key, k1, k2 = jax.random.split(key, 3)
    params["w_in"] = uni(k1, (d_model, input_dim), input_dim)
    params["b_in"] = uni(k2, (d_model,), input_dim)
    for l in range(num_layers):
        key, *ks = jax.random.split(key, 13)
        params[f"w_q_{l}"] = uni(ks[0], (d_model, d_model), d_model)
        params[f"b_q_{l}"] = uni(ks[1], (d_model,), d_model)
        params[f"w_k_{l}"] = uni(ks[2], (d_model, d_model), d_model)
        params[f"b_k_{l}"] = uni(ks[3], (d_model,), d_model)
        params[f"w_v_{l}"] = uni(ks[4], (d_model, d_model), d_model)
        params[f"b_v_{l}"] = uni(ks[5], (d_model,), d_model)
        params[f"w_o_{l}"] = uni(ks[6], (d_model, d_model), d_model)
        params[f"b_o_{l}"] = uni(ks[7], (d_model,), d_model)
        params[f"ln1_g_{l}"] = jnp.ones((d_model,), jnp.float32)
        params[f"ln1_b_{l}"] = jnp.zeros((d_model,), jnp.float32)
        params[f"w_ff1_{l}"] = uni(ks[8], (d_ff, d_model), d_model)
        params[f"b_ff1_{l}"] = uni(ks[9], (d_ff,), d_model)
        params[f"w_ff2_{l}"] = uni(ks[10], (d_model, d_ff), d_ff)
        params[f"b_ff2_{l}"] = uni(ks[11], (d_model,), d_ff)
        params[f"ln2_g_{l}"] = jnp.ones((d_model,), jnp.float32)
        params[f"ln2_b_{l}"] = jnp.zeros((d_model,), jnp.float32)
    key, k3, k4 = jax.random.split(key, 3)
    params["w_out"] = uni(k3, (output_dim, d_model), d_model)
    params["b_out"] = uni(k4, (output_dim,), d_model)
    return params


def _choose_batch_block(B, T):
    """Largest divisor of B such that Bt*T rows give decent MXU M-dim fill."""
    target_rows = 512
    bt = max(1, min(B, max(1, target_rows // max(T, 1))))
    while B % bt:
        bt -= 1
    return bt


def transformer_forward(x, params, d_model, nhead, num_layers, output_dim):
    """x: (B, T, input_dim) float32 -> (B, output_dim) float32"""
    B, T, D_in = x.shape
    x = x.astype(jnp.float32)
    Bt = _choose_batch_block(B, T)
    n_b_blocks = B // Bt

    pe = positional_encoding(T, d_model)
    pe_tiled = jnp.tile(pe, (Bt, 1))        # (Bt*T, D): PE broadcast hoisted to wrapper

    # Pre-transposed weights (kernel does plain `act @ W`), layers stacked on axis 0.
    def stack_w(name):
        return jnp.stack([params[f"{name}_{l}"].T for l in range(num_layers)])

    def stack_b(name):
        return jnp.stack([params[f"{name}_{l}"].reshape(1, -1) for l in range(num_layers)])

    flat = [
        x,
        params["w_in"].T, params["b_in"].reshape(1, -1), pe_tiled,
        stack_w("w_q"), stack_b("b_q"),
        stack_w("w_k"), stack_b("b_k"),
        stack_w("w_v"), stack_b("b_v"),
        stack_w("w_o"), stack_b("b_o"),
        stack_b("ln1_g"), stack_b("ln1_b"),
        stack_w("w_ff1"), stack_b("b_ff1"),
        stack_w("w_ff2"), stack_b("b_ff2"),
        stack_b("ln2_g"), stack_b("ln2_b"),
        params["w_out"].T, params["b_out"].reshape(1, -1),
    ]

    def const_spec(arr):   # constant block index -> fetched once, stays resident
        nd = arr.ndim
        return pl.BlockSpec(arr.shape, lambda b, l, nd=nd: (0,) * nd)

    def layer_spec(arr):   # layer-stacked weights: one layer per grid step
        rest = arr.shape[1:]
        zeros = (0,) * len(rest)
        return pl.BlockSpec((None,) + rest, lambda b, l, zeros=zeros: (l,) + zeros)

    in_specs = (
        [pl.BlockSpec((Bt, T, D_in), lambda b, l: (b, 0, 0)),
         const_spec(flat[1]), const_spec(flat[2]), const_spec(flat[3])]
        + [layer_spec(a) for a in flat[4:20]]
        + [const_spec(flat[20]), const_spec(flat[21])]
    )

    grid_spec = pltpu.PrefetchScalarGridSpec(
        num_scalar_prefetch=0,
        grid=(n_b_blocks, num_layers),              # batch outer, layer inner
        in_specs=in_specs,
        out_specs=pl.BlockSpec((Bt, output_dim), lambda b, l: (b, 0)),
        scratch_shapes=[pltpu.VMEM((Bt * T, d_model), jnp.float32)],
    )

    kernel = functools.partial(_transformer_layer_kernel, nhead)
    out = pl.pallas_call(
        kernel,
        grid_spec=grid_spec,
        out_shape=jax.ShapeDtypeStruct((B, output_dim), jnp.float32),
        compiler_params=pltpu.CompilerParams(
            dimension_semantics=("parallel", "arbitrary"),
            vmem_limit_bytes=48 * 1024 * 1024),
    )(*flat)
    return out


def _reference_forward(x, params, d_model, nhead, num_layers, output_dim):
    """Pure-JAX reference of the same forward pass (for correctness check)."""
    B, T, _ = x.shape
    hd = d_model // nhead
    pe = positional_encoding(T, d_model)

    def ln(z, g, b):
        mean = jnp.mean(z, axis=-1, keepdims=True)
        var = jnp.mean(jnp.square(z - mean), axis=-1, keepdims=True)
        return (z - mean) / jnp.sqrt(var + _LN_EPS) * g + b

    h = x @ params["w_in"].T + params["b_in"] + pe[None]
    for l in range(num_layers):
        q = h @ params[f"w_q_{l}"].T + params[f"b_q_{l}"]
        k = h @ params[f"w_k_{l}"].T + params[f"b_k_{l}"]
        v = h @ params[f"w_v_{l}"].T + params[f"b_v_{l}"]
        q = q.reshape(B, T, nhead, hd).transpose(0, 2, 1, 3)
        k = k.reshape(B, T, nhead, hd).transpose(0, 2, 1, 3)
        v = v.reshape(B, T, nhead, hd).transpose(0, 2, 1, 3)
        s = jnp.einsum("bhqd,bhkd->bhqk", q, k) / math.sqrt(hd)
        p = jax.nn.softmax(s, axis=-1)
        ctx = jnp.einsum("bhqk,bhkd->bhqd", p, v)
        ctx = ctx.transpose(0, 2, 1, 3).reshape(B, T, d_model)
        attn_out = ctx @ params[f"w_o_{l}"].T + params[f"b_o_{l}"]
        h = ln(h + attn_out, params[f"ln1_g_{l}"], params[f"ln1_b_{l}"])
        ff = jax.nn.relu(h @ params[f"w_ff1_{l}"].T + params[f"b_ff1_{l}"])
        ff = ff @ params[f"w_ff2_{l}"].T + params[f"b_ff2_{l}"]
        h = ln(h + ff, params[f"ln2_g_{l}"], params[f"ln2_b_{l}"])
    last = h[:, -1, :]
    return last @ params["w_out"].T + params["b_out"]


if __name__ == "__main__":
    # Small shapes consistent with the module's forward: x [B, T, input_dim]
    B, T = 2, 8
    INPUT_DIM, D_MODEL, NHEAD, NUM_LAYERS, OUTPUT_DIM = 8, 32, 4, 2, 1

    key = jax.random.PRNGKey(0)
    k_x, k_p = jax.random.split(key)
    x = jax.random.normal(k_x, (B, T, INPUT_DIM), jnp.float32)
    params = init_transformer_params(k_p, INPUT_DIM, D_MODEL, NHEAD,
                                     NUM_LAYERS, OUTPUT_DIM)

    out = transformer_forward(x, params, D_MODEL, NHEAD, NUM_LAYERS, OUTPUT_DIM)
    out = jax.block_until_ready(out)
    assert out.shape == (B, OUTPUT_DIM)

    ref = _reference_forward(x, params, D_MODEL, NHEAD, NUM_LAYERS, OUTPUT_DIM)
    assert jnp.allclose(out, ref, atol=1e-3, rtol=1e-3), (out, ref)

    print("KERNEL_OK")
</pallas_src>

<mosaic_0001>
module attributes {stable_mosaic.version = 11 : i64} {
  func.func @_transformer_layer_kernel(%arg0: i32, %arg1: i32, %arg2: memref<2x8x8xf32, #tpu.memory_space<vmem>>, %arg3: memref<8x32xf32, #tpu.memory_space<vmem>>, %arg4: memref<1x32xf32, #tpu.memory_space<vmem>>, %arg5: memref<16x32xf32, #tpu.memory_space<vmem>>, %arg6: memref<1x32x32xf32, #tpu.memory_space<vmem>>, %arg7: memref<1x1x32xf32, #tpu.memory_space<vmem>>, %arg8: memref<1x32x32xf32, #tpu.memory_space<vmem>>, %arg9: memref<1x1x32xf32, #tpu.memory_space<vmem>>, %arg10: memref<1x32x32xf32, #tpu.memory_space<vmem>>, %arg11: memref<1x1x32xf32, #tpu.memory_space<vmem>>, %arg12: memref<1x32x32xf32, #tpu.memory_space<vmem>>, %arg13: memref<1x1x32xf32, #tpu.memory_space<vmem>>, %arg14: memref<1x1x32xf32, #tpu.memory_space<vmem>>, %arg15: memref<1x1x32xf32, #tpu.memory_space<vmem>>, %arg16: memref<1x32x128xf32, #tpu.memory_space<vmem>>, %arg17: memref<1x1x128xf32, #tpu.memory_space<vmem>>, %arg18: memref<1x128x32xf32, #tpu.memory_space<vmem>>, %arg19: memref<1x1x32xf32, #tpu.memory_space<vmem>>, %arg20: memref<1x1x32xf32, #tpu.memory_space<vmem>>, %arg21: memref<1x1x32xf32, #tpu.memory_space<vmem>>, %arg22: memref<32x1xf32, #tpu.memory_space<vmem>>, %arg23: memref<1x1xf32, #tpu.memory_space<vmem>>, %arg24: memref<2x1xf32, #tpu.memory_space<vmem>>, %arg25: memref<16x32xf32, #tpu.memory_space<vmem>>) attributes {dimension_semantics = [#tpu.dimension_semantics<parallel>, #tpu.dimension_semantics<arbitrary>], iteration_bounds = array<i64: 1, 2>, scalar_prefetch = 0 : i64, scratch_operands = 1 : i64, tpu.core_type = #tpu.core_type<tc>, window_params = [{transform_indices = @transform_0, window_bounds = array<i64: 2, 8, 8>}, {pipeline_mode = #tpu.pipeline_mode<synchronous>, transform_indices = @transform_1, window_bounds = array<i64: 8, 32>}, {pipeline_mode = #tpu.pipeline_mode<synchronous>, transform_indices = @transform_2, window_bounds = array<i64: 1, 32>}, {pipeline_mode = #tpu.pipeline_mode<synchronous>, transform_indices = @transform_3, window_bounds = array<i64: 16, 32>}, {transform_indices = @transform_4, window_bounds = array<i64: 1, 32, 32>}, {transform_indices = @transform_5, window_bounds = array<i64: 1, 1, 32>}, {transform_indices = @transform_6, window_bounds = array<i64: 1, 32, 32>}, {transform_indices = @transform_7, window_bounds = array<i64: 1, 1, 32>}, {transform_indices = @transform_8, window_bounds = array<i64: 1, 32, 32>}, {transform_indices = @transform_9, window_bounds = array<i64: 1, 1, 32>}, {transform_indices = @transform_10, window_bounds = array<i64: 1, 32, 32>}, {transform_indices = @transform_11, window_bounds = array<i64: 1, 1, 32>}, {transform_indices = @transform_12, window_bounds = array<i64: 1, 1, 32>}, {transform_indices = @transform_13, window_bounds = array<i64: 1, 1, 32>}, {transform_indices = @transform_14, window_bounds = array<i64: 1, 32, 128>}, {transform_indices = @transform_15, window_bounds = array<i64: 1, 1, 128>}, {transform_indices = @transform_16, window_bounds = array<i64: 1, 128, 32>}, {transform_indices = @transform_17, window_bounds = array<i64: 1, 1, 32>}, {transform_indices = @transform_18, window_bounds = array<i64: 1, 1, 32>}, {transform_indices = @transform_19, window_bounds = array<i64: 1, 1, 32>}, {pipeline_mode = #tpu.pipeline_mode<synchronous>, transform_indices = @transform_20, window_bounds = array<i64: 32, 1>}, {pipeline_mode = #tpu.pipeline_mode<synchronous>, transform_indices = @transform_21, window_bounds = array<i64: 1, 1>}, {transform_indices = @transform_22, window_bounds = array<i64: 2, 1>}]} {
    %c0_i32 = arith.constant 0 : i32
    %0 = arith.cmpi eq, %arg1, %c0_i32 : i32
    %1 = arith.extui %0 : i1 to i32
    %c0_i32_0 = arith.constant 0 : i32
    %2 = arith.cmpi ne, %1, %c0_i32_0 : i32
    scf.if %2 {
      %c0_98 = arith.constant 0 : index
      %c0_99 = arith.constant 0 : index
      %c0_100 = arith.constant 0 : index
      %202 = vector.load %arg2[%c0_98, %c0_99, %c0_100] : memref<2x8x8xf32, #tpu.memory_space<vmem>>, vector<2x8x8xf32>
      %203 = vector.shape_cast %202 : vector<2x8x8xf32> to vector<16x8xf32>
      %c0_101 = arith.constant 0 : index
      %c0_102 = arith.constant 0 : index
      %204 = vector.load %arg3[%c0_101, %c0_102] : memref<8x32xf32, #tpu.memory_space<vmem>>, vector<8x32xf32>
      %cst_103 = arith.constant dense<0.000000e+00> : vector<16x32xf32>
      %205 = tpu.matmul %203, %204, %cst_103 {dimension_numbers = #tpu.dot_dimension_numbers<[1], [0], [0], [1], [0, 0, 1, 1], [], []>} : vector<16x8xf32>, vector<8x32xf32>, vector<16x32xf32> -> vector<16x32xf32>
      %c0_104 = arith.constant 0 : index
      %c0_105 = arith.constant 0 : index
      %206 = vector.load %arg4[%c0_104, %c0_105] : memref<1x32xf32, #tpu.memory_space<vmem>>, vector<1x32xf32>
      %207 = vector.broadcast %206 : vector<1x32xf32> to vector<16x32xf32>
      %208 = arith.addf %205, %207 : vector<16x32xf32>
      %c0_106 = arith.constant 0 : index
      %c0_107 = arith.constant 0 : index
      %209 = vector.load %arg5[%c0_106, %c0_107] : memref<16x32xf32, #tpu.memory_space<vmem>>, vector<16x32xf32>
      %210 = arith.addf %208, %209 : vector<16x32xf32>
      %c0_108 = arith.constant 0 : index
      %c0_109 = arith.constant 0 : index
      %211 = vector.load %arg25[%c0_108, %c0_109] : memref<16x32xf32, #tpu.memory_space<vmem>>, vector<16x32xf32>
      tpu.vector_store %arg25[%c0_108, %c0_109], %210 {strides = array<i32>} : memref<16x32xf32, #tpu.memory_space<vmem>>, vector<16x32xf32>,
    } else {
    }
    %c0 = arith.constant 0 : index
    %c0_1 = arith.constant 0 : index
    %3 = vector.load %arg25[%c0, %c0_1] : memref<16x32xf32, #tpu.memory_space<vmem>>, vector<16x32xf32>
    %c0_2 = arith.constant 0 : index
    %c0_3 = arith.constant 0 : index
    %c0_4 = arith.constant 0 : index
    %4 = vector.load %arg6[%c0_2, %c0_3, %c0_4] : memref<1x32x32xf32, #tpu.memory_space<vmem>>, vector<1x32x32xf32>
    %5 = vector.shape_cast %4 : vector<1x32x32xf32> to vector<32x32xf32>
    %cst = arith.constant dense<0.000000e+00> : vector<16x32xf32>
    %6 = tpu.matmul %3, %5, %cst {dimension_numbers = #tpu.dot_dimension_numbers<[1], [0], [0], [1], [0, 0, 1, 1], [], []>} : vector<16x32xf32>, vector<32x32xf32>, vector<16x32xf32> -> vector<16x32xf32>
    %c0_5 = arith.constant 0 : index
    %c0_6 = arith.constant 0 : index
    %c0_7 = arith.constant 0 : index
    %7 = vector.load %arg7[%c0_5, %c0_6, %c0_7] : memref<1x1x32xf32, #tpu.memory_space<vmem>>, vector<1x1x32xf32>
    %8 = vector.shape_cast %7 : vector<1x1x32xf32> to vector<1x32xf32>
    %9 = vector.broadcast %8 : vector<1x32xf32> to vector<16x32xf32>
    %10 = arith.addf %6, %9 : vector<16x32xf32>
    %c0_8 = arith.constant 0 : index
    %c0_9 = arith.constant 0 : index
    %c0_10 = arith.constant 0 : index
    %11 = vector.load %arg8[%c0_8, %c0_9, %c0_10] : memref<1x32x32xf32, #tpu.memory_space<vmem>>, vector<1x32x32xf32>
    %12 = vector.shape_cast %11 : vector<1x32x32xf32> to vector<32x32xf32>
    %cst_11 = arith.constant dense<0.000000e+00> : vector<16x32xf32>
    %13 = tpu.matmul %3, %12, %cst_11 {dimension_numbers = #tpu.dot_dimension_numbers<[1], [0], [0], [1], [0, 0, 1, 1], [], []>} : vector<16x32xf32>, vector<32x32xf32>, vector<16x32xf32> -> vector<16x32xf32>
    %c0_12 = arith.constant 0 : index
    %c0_13 = arith.constant 0 : index
    %c0_14 = arith.constant 0 : index
    %14 = vector.load %arg9[%c0_12, %c0_13, %c0_14] : memref<1x1x32xf32, #tpu.memory_space<vmem>>, vector<1x1x32xf32>
    %15 = vector.shape_cast %14 : vector<1x1x32xf32> to vector<1x32xf32>
    %16 = vector.broadcast %15 : vector<1x32xf32> to vector<16x32xf32>
    %17 = arith.addf %13, %16 : vector<16x32xf32>
    %c0_15 = arith.constant 0 : index
    %c0_16 = arith.constant 0 : index
    %c0_17 = arith.constant 0 : index
    %18 = vector.load %arg10[%c0_15, %c0_16, %c0_17] : memref<1x32x32xf32, #tpu.memory_space<vmem>>, vector<1x32x32xf32>
    %19 = vector.shape_cast %18 : vector<1x32x32xf32> to vector<32x32xf32>
    %cst_18 = arith.constant dense<0.000000e+00> : vector<16x32xf32>
    %20 = tpu.matmul %3, %19, %cst_18 {dimension_numbers = #tpu.dot_dimension_numbers<[1], [0], [0], [1], [0, 0, 1, 1], [], []>} : vector<16x32xf32>, vector<32x32xf32>, vector<16x32xf32> -> vector<16x32xf32>
    %c0_19 = arith.constant 0 : index
    %c0_20 = arith.constant 0 : index
    %c0_21 = arith.constant 0 : index
    %21 = vector.load %arg11[%c0_19, %c0_20, %c0_21] : memref<1x1x32xf32, #tpu.memory_space<vmem>>, vector<1x1x32xf32>
    %22 = vector.shape_cast %21 : vector<1x1x32xf32> to vector<1x32xf32>
    %23 = vector.broadcast %22 : vector<1x32xf32> to vector<16x32xf32>
    %24 = arith.addf %20, %23 : vector<16x32xf32>
    %c0_22 = arith.constant 0 : index
    %c0_23 = arith.constant 0 : index
    %c0_24 = arith.constant 0 : index
    %25 = vector.load %arg13[%c0_22, %c0_23, %c0_24] : memref<1x1x32xf32, #tpu.memory_space<vmem>>, vector<1x1x32xf32>
    %26 = vector.shape_cast %25 : vector<1x1x32xf32> to vector<1x32xf32>
    %27 = vector.extract_strided_slice %10 {offsets = [0, 0], sizes = [16, 8], strides = [1, 1]} : vector<16x32xf32> to vector<16x8xf32>
    %28 = vector.shape_cast %27 : vector<16x8xf32> to vector<2x8x8xf32>
    %29 = vector.extract_strided_slice %17 {offsets = [0, 0], sizes = [16, 8], strides = [1, 1]} : vector<16x32xf32> to vector<16x8xf32>
    %30 = vector.shape_cast %29 : vector<16x8xf32> to vector<2x8x8xf32>
    %31 = vector.extract_strided_slice %24 {offsets = [0, 0], sizes = [16, 8], strides = [1, 1]} : vector<16x32xf32> to vector<16x8xf32>
    %32 = vector.shape_cast %31 : vector<16x8xf32> to vector<2x8x8xf32>
    %cst_25 = arith.constant dense<0.000000e+00> : vector<2x8x8xf32>
    %33 = tpu.matmul %28, %30, %cst_25 {dimension_numbers = #tpu.dot_dimension_numbers<[2], [2], [1], [1], [0, 0, 0, 1, 1, 1], [0], [0]>} : vector<2x8x8xf32>, vector<2x8x8xf32>, vector<2x8x8xf32> -> vector<2x8x8xf32>
    %cst_26 = arith.constant 0.353553385 : f32
    %34 = vector.broadcast %cst_26 : f32 to vector<2x8x8xf32>
    %35 = arith.mulf %33, %34 : vector<2x8x8xf32>
    %cst_27 = arith.constant dense<0xFF800000> : vector<2x8xf32>
    %36 = vector.multi_reduction <maximumf>, %35, %cst_27 [2] : vector<2x8x8xf32> to vector<2x8xf32>
    %37 = vector.shape_cast %36 : vector<2x8xf32> to vector<2x8x1xf32>
    %38 = vector.broadcast %37 : vector<2x8x1xf32> to vector<2x8x8xf32>
    %39 = arith.subf %35, %38 : vector<2x8x8xf32>
    %40 = math.exp %39 : vector<2x8x8xf32>
    %cst_28 = arith.constant dense<0.000000e+00> : vector<2x8xf32>
    %41 = vector.multi_reduction <add>, %40, %cst_28 [2] : vector<2x8x8xf32> to vector<2x8xf32>
    %42 = vector.shape_cast %41 : vector<2x8xf32> to vector<2x8x1xf32>
    %43 = tpu.reciprocal %42 : vector<2x8x1xf32> -> vector<2x8x1xf32>
    %44 = vector.broadcast %43 : vector<2x8x1xf32> to vector<2x8x8xf32>
    %45 = arith.mulf %40, %44 : vector<2x8x8xf32>
    %cst_29 = arith.constant dense<0.000000e+00> : vector<2x8x8xf32>
    %46 = tpu.matmul %45, %32, %cst_29 {dimension_numbers = #tpu.dot_dimension_numbers<[2], [1], [1], [2], [0, 0, 0, 1, 1, 2], [0], [0]>} : vector<2x8x8xf32>, vector<2x8x8xf32>, vector<2x8x8xf32> -> vector<2x8x8xf32>
    %47 = vector.shape_cast %46 : vector<2x8x8xf32> to vector<16x8xf32>
    %c0_30 = arith.constant 0 : index
    %c0_31 = arith.constant 0 : index
    %c0_32 = arith.constant 0 : index
    %48 = vector.load %arg12[%c0_30, %c0_31, %c0_32] : memref<1x32x32xf32, #tpu.memory_space<vmem>>, vector<1x8x32xf32>
    %49 = vector.shape_cast %48 : vector<1x8x32xf32> to vector<8x32xf32>
    %cst_33 = arith.constant dense<0.000000e+00> : vector<16x32xf32>
    %50 = tpu.matmul %47, %49, %cst_33 {dimension_numbers = #tpu.dot_dimension_numbers<[1], [0], [0], [1], [0, 0, 1, 1], [], []>} : vector<16x8xf32>, vector<8x32xf32>, vector<16x32xf32> -> vector<16x32xf32>
    %51 = vector.broadcast %26 : vector<1x32xf32> to vector<16x32xf32>
    %52 = arith.addf %51, %50 : vector<16x32xf32>
    %53 = vector.extract_strided_slice %10 {offsets = [0, 8], sizes = [16, 8], strides = [1, 1]} : vector<16x32xf32> to vector<16x8xf32>
    %54 = vector.shape_cast %53 : vector<16x8xf32> to vector<2x8x8xf32>
    %55 = vector.extract_strided_slice %17 {offsets = [0, 8], sizes = [16, 8], strides = [1, 1]} : vector<16x32xf32> to vector<16x8xf32>
    %56 = vector.shape_cast %55 : vector<16x8xf32> to vector<2x8x8xf32>
    %57 = vector.extract_strided_slice %24 {offsets = [0, 8], sizes = [16, 8], strides = [1, 1]} : vector<16x32xf32> to vector<16x8xf32>
    %58 = vector.shape_cast %57 : vector<16x8xf32> to vector<2x8x8xf32>
    %cst_34 = arith.constant dense<0.000000e+00> : vector<2x8x8xf32>
    %59 = tpu.matmul %54, %56, %cst_34 {dimension_numbers = #tpu.dot_dimension_numbers<[2], [2], [1], [1], [0, 0, 0, 1, 1, 1], [0], [0]>} : vector<2x8x8xf32>, vector<2x8x8xf32>, vector<2x8x8xf32> -> vector<2x8x8xf32>
    %cst_35 = arith.constant 0.353553385 : f32
    %60 = vector.broadcast %cst_35 : f32 to vector<2x8x8xf32>
    %61 = arith.mulf %59, %60 : vector<2x8x8xf32>
    %cst_36 = arith.constant dense<0xFF800000> : vector<2x8xf32>
    %62 = vector.multi_reduction <maximumf>, %61, %cst_36 [2] : vector<2x8x8xf32> to vector<2x8xf32>
    %63 = vector.shape_cast %62 : vector<2x8xf32> to vector<2x8x1xf32>
    %64 = vector.broadcast %63 : vector<2x8x1xf32> to vector<2x8x8xf32>
    %65 = arith.subf %61, %64 : vector<2x8x8xf32>
    %66 = math.exp %65 : vector<2x8x8xf32>
    %cst_37 = arith.constant dense<0.000000e+00> : vector<2x8xf32>
    %67 = vector.multi_reduction <add>, %66, %cst_37 [2] : vector<2x8x8xf32> to vector<2x8xf32>
    %68 = vector.shape_cast %67 : vector<2x8xf32> to vector<2x8x1xf32>
    %69 = tpu.reciprocal %68 : vector<2x8x1xf32> -> vector<2x8x1xf32>
    %70 = vector.broadcast %69 : vector<2x8x1xf32> to vector<2x8x8xf32>
    %71 = arith.mulf %66, %70 : vector<2x8x8xf32>
    %cst_38 = arith.constant dense<0.000000e+00> : vector<2x8x8xf32>
    %72 = tpu.matmul %71, %58, %cst_38 {dimension_numbers = #tpu.dot_dimension_numbers<[2], [1], [1], [2], [0, 0, 0, 1, 1, 2], [0], [0]>} : vector<2x8x8xf32>, vector<2x8x8xf32>, vector<2x8x8xf32> -> vector<2x8x8xf32>
    %73 = vector.shape_cast %72 : vector<2x8x8xf32> to vector<16x8xf32>
    %c0_39 = arith.constant 0 : index
    %c8 = arith.constant 8 : index
    %c0_40 = arith.constant 0 : index
    %74 = vector.load %arg12[%c0_39, %c8, %c0_40] : memref<1x32x32xf32, #tpu.memory_space<vmem>>, vector<1x8x32xf32>
    %75 = vector.shape_cast %74 : vector<1x8x32xf32> to vector<8x32xf32>
    %cst_41 = arith.constant dense<0.000000e+00> : vector<16x32xf32>
    %76 = tpu.matmul %73, %75, %cst_41 {dimension_numbers = #tpu.dot_dimension_numbers<[1], [0], [0], [1], [0, 0, 1, 1], [], []>} : vector<16x8xf32>, vector<8x32xf32>, vector<16x32xf32> -> vector<16x32xf32>
    %77 = arith.addf %52, %76 : vector<16x32xf32>
    %78 = vector.extract_strided_slice %10 {offsets = [0, 16], sizes = [16, 8], strides = [1, 1]} : vector<16x32xf32> to vector<16x8xf32>
    %79 = vector.shape_cast %78 : vector<16x8xf32> to vector<2x8x8xf32>
    %80 = vector.extract_strided_slice %17 {offsets = [0, 16], sizes = [16, 8], strides = [1, 1]} : vector<16x32xf32> to vector<16x8xf32>
    %81 = vector.shape_cast %80 : vector<16x8xf32> to vector<2x8x8xf32>
    %82 = vector.extract_strided_slice %24 {offsets = [0, 16], sizes = [16, 8], strides = [1, 1]} : vector<16x32xf32> to vector<16x8xf32>
    %83 = vector.shape_cast %82 : vector<16x8xf32> to vector<2x8x8xf32>
    %cst_42 = arith.constant dense<0.000000e+00> : vector<2x8x8xf32>
    %84 = tpu.matmul %79, %81, %cst_42 {dimension_numbers = #tpu.dot_dimension_numbers<[2], [2], [1], [1], [0, 0, 0, 1, 1, 1], [0], [0]>} : vector<2x8x8xf32>, vector<2x8x8xf32>, vector<2x8x8xf32> -> vector<2x8x8xf32>
    %cst_43 = arith.constant 0.353553385 : f32
    %85 = vector.broadcast %cst_43 : f32 to vector<2x8x8xf32>
    %86 = arith.mulf %84, %85 : vector<2x8x8xf32>
    %cst_44 = arith.constant dense<0xFF800000> : vector<2x8xf32>
    %87 = vector.multi_reduction <maximumf>, %86, %cst_44 [2] : vector<2x8x8xf32> to vector<2x8xf32>
    %88 = vector.shape_cast %87 : vector<2x8xf32> to vector<2x8x1xf32>
    %89 = vector.broadcast %88 : vector<2x8x1xf32> to vector<2x8x8xf32>
    %90 = arith.subf %86, %89 : vector<2x8x8xf32>
    %91 = math.exp %90 : vector<2x8x8xf32>
    %cst_45 = arith.constant dense<0.000000e+00> : vector<2x8xf32>
    %92 = vector.multi_reduction <add>, %91, %cst_45 [2] : vector<2x8x8xf32> to vector<2x8xf32>
    %93 = vector.shape_cast %92 : vector<2x8xf32> to vector<2x8x1xf32>
    %94 = tpu.reciprocal %93 : vector<2x8x1xf32> -> vector<2x8x1xf32>
    %95 = vector.broadcast %94 : vector<2x8x1xf32> to vector<2x8x8xf32>
    %96 = arith.mulf %91, %95 : vector<2x8x8xf32>
    %cst_46 = arith.constant dense<0.000000e+00> : vector<2x8x8xf32>
    %97 = tpu.matmul %96, %83, %cst_46 {dimension_numbers = #tpu.dot_dimension_numbers<[2], [1], [1], [2], [0, 0, 0, 1, 1, 2], [0], [0]>} : vector<2x8x8xf32>, vector<2x8x8xf32>, vector<2x8x8xf32> -> vector<2x8x8xf32>
    %98 = vector.shape_cast %97 : vector<2x8x8xf32> to vector<16x8xf32>
    %c0_47 = arith.constant 0 : index
    %c16 = arith.constant 16 : index
    %c0_48 = arith.constant 0 : index
    %99 = vector.load %arg12[%c0_47, %c16, %c0_48] : memref<1x32x32xf32, #tpu.memory_space<vmem>>, vector<1x8x32xf32>
    %100 = vector.shape_cast %99 : vector<1x8x32xf32> to vector<8x32xf32>
    %cst_49 = arith.constant dense<0.000000e+00> : vector<16x32xf32>
    %101 = tpu.matmul %98, %100, %cst_49 {dimension_numbers = #tpu.dot_dimension_numbers<[1], [0], [0], [1], [0, 0, 1, 1], [], []>} : vector<16x8xf32>, vector<8x32xf32>, vector<16x32xf32> -> vector<16x32xf32>
    %102 = arith.addf %77, %101 : vector<16x32xf32>
    %103 = vector.extract_strided_slice %10 {offsets = [0, 24], sizes = [16, 8], strides = [1, 1]} : vector<16x32xf32> to vector<16x8xf32>
    %104 = vector.shape_cast %103 : vector<16x8xf32> to vector<2x8x8xf32>
    %105 = vector.extract_strided_slice %17 {offsets = [0, 24], sizes = [16, 8], strides = [1, 1]} : vector<16x32xf32> to vector<16x8xf32>
    %106 = vector.shape_cast %105 : vector<16x8xf32> to vector<2x8x8xf32>
    %107 = vector.extract_strided_slice %24 {offsets = [0, 24], sizes = [16, 8], strides = [1, 1]} : vector<16x32xf32> to vector<16x8xf32>
    %108 = vector.shape_cast %107 : vector<16x8xf32> to vector<2x8x8xf32>
    %cst_50 = arith.constant dense<0.000000e+00> : vector<2x8x8xf32>
    %109 = tpu.matmul %104, %106, %cst_50 {dimension_numbers = #tpu.dot_dimension_numbers<[2], [2], [1], [1], [0, 0, 0, 1, 1, 1], [0], [0]>} : vector<2x8x8xf32>, vector<2x8x8xf32>, vector<2x8x8xf32> -> vector<2x8x8xf32>
    %cst_51 = arith.constant 0.353553385 : f32
    %110 = vector.broadcast %cst_51 : f32 to vector<2x8x8xf32>
    %111 = arith.mulf %109, %110 : vector<2x8x8xf32>
    %cst_52 = arith.constant dense<0xFF800000> : vector<2x8xf32>
    %112 = vector.multi_reduction <maximumf>, %111, %cst_52 [2] : vector<2x8x8xf32> to vector<2x8xf32>
    %113 = vector.shape_cast %112 : vector<2x8xf32> to vector<2x8x1xf32>
    %114 = vector.broadcast %113 : vector<2x8x1xf32> to vector<2x8x8xf32>
    %115 = arith.subf %111, %114 : vector<2x8x8xf32>
    %116 = math.exp %115 : vector<2x8x8xf32>
    %cst_53 = arith.constant dense<0.000000e+00> : vector<2x8xf32>
    %117 = vector.multi_reduction <add>, %116, %cst_53 [2] : vector<2x8x8xf32> to vector<2x8xf32>
    %118 = vector.shape_cast %117 : vector<2x8xf32> to vector<2x8x1xf32>
    %119 = tpu.reciprocal %118 : vector<2x8x1xf32> -> vector<2x8x1xf32>
    %120 = vector.broadcast %119 : vector<2x8x1xf32> to vector<2x8x8xf32>
    %121 = arith.mulf %116, %120 : vector<2x8x8xf32>
    %cst_54 = arith.constant dense<0.000000e+00> : vector<2x8x8xf32>
    %122 = tpu.matmul %121, %108, %cst_54 {dimension_numbers = #tpu.dot_dimension_numbers<[2], [1], [1], [2], [0, 0, 0, 1, 1, 2], [0], [0]>} : vector<2x8x8xf32>, vector<2x8x8xf32>, vector<2x8x8xf32> -> vector<2x8x8xf32>
    %123 = vector.shape_cast %122 : vector<2x8x8xf32> to vector<16x8xf32>
    %c0_55 = arith.constant 0 : index
    %c24 = arith.constant 24 : index
    %c0_56 = arith.constant 0 : index
    %124 = vector.load %arg12[%c0_55, %c24, %c0_56] : memref<1x32x32xf32, #tpu.memory_space<vmem>>, vector<1x8x32xf32>
    %125 = vector.shape_cast %124 : vector<1x8x32xf32> to vector<8x32xf32>
    %cst_57 = arith.constant dense<0.000000e+00> : vector<16x32xf32>
    %126 = tpu.matmul %123, %125, %cst_57 {dimension_numbers = #tpu.dot_dimension_numbers<[1], [0], [0], [1], [0, 0, 1, 1], [], []>} : vector<16x8xf32>, vector<8x32xf32>, vector<16x32xf32> -> vector<16x32xf32>
    %127 = arith.addf %102, %126 : vector<16x32xf32>
    %128 = arith.addf %3, %127 : vector<16x32xf32>
    %c0_58 = arith.constant 0 : index
    %c0_59 = arith.constant 0 : index
    %c0_60 = arith.constant 0 : index
    %129 = vector.load %arg14[%c0_58, %c0_59, %c0_60] : memref<1x1x32xf32, #tpu.memory_space<vmem>>, vector<1x1x32xf32>
    %130 = vector.shape_cast %129 : vector<1x1x32xf32> to vector<1x32xf32>
    %c0_61 = arith.constant 0 : index
    %c0_62 = arith.constant 0 : index
    %c0_63 = arith.constant 0 : index
    %131 = vector.load %arg15[%c0_61, %c0_62, %c0_63] : memref<1x1x32xf32, #tpu.memory_space<vmem>>, vector<1x1x32xf32>
    %132 = vector.shape_cast %131 : vector<1x1x32xf32> to vector<1x32xf32>
    %cst_64 = arith.constant dense<0.000000e+00> : vector<16xf32>
    %133 = vector.multi_reduction <add>, %128, %cst_64 [1] : vector<16x32xf32> to vector<16xf32>
    %134 = vector.shape_cast %133 : vector<16xf32> to vector<16x1xf32>
    %cst_65 = arith.constant 3.200000e+01 : f32
    %135 = vector.broadcast %cst_65 : f32 to vector<16x1xf32>
    %136 = arith.divf %134, %135 : vector<16x1xf32>
    %137 = vector.broadcast %136 : vector<16x1xf32> to vector<16x32xf32>
    %138 = arith.subf %128, %137 : vector<16x32xf32>
    %139 = arith.mulf %138, %138 : vector<16x32xf32>
    %cst_66 = arith.constant dense<0.000000e+00> : vector<16xf32>
    %140 = vector.multi_reduction <add>, %139, %cst_66 [1] : vector<16x32xf32> to vector<16xf32>
    %141 = vector.shape_cast %140 : vector<16xf32> to vector<16x1xf32>
    %cst_67 = arith.constant 3.200000e+01 : f32
    %142 = vector.broadcast %cst_67 : f32 to vector<16x1xf32>
    %143 = arith.divf %141, %142 : vector<16x1xf32>
    %144 = vector.broadcast %136 : vector<16x1xf32> to vector<16x32xf32>
    %145 = arith.subf %128, %144 : vector<16x32xf32>
    %cst_68 = arith.constant 9.99999974E-6 : f32
    %146 = vector.broadcast %cst_68 : f32 to vector<16x1xf32>
    %147 = arith.addf %143, %146 : vector<16x1xf32>
    %148 = math.rsqrt %147 : vector<16x1xf32>
    %149 = vector.broadcast %148 : vector<16x1xf32> to vector<16x32xf32>
    %150 = arith.mulf %145, %149 : vector<16x32xf32>
    %151 = vector.broadcast %130 : vector<1x32xf32> to vector<16x32xf32>
    %152 = arith.mulf %150, %151 : vector<16x32xf32>
    %153 = vector.broadcast %132 : vector<1x32xf32> to vector<16x32xf32>
    %154 = arith.addf %152, %153 : vector<16x32xf32>
    %c0_69 = arith.constant 0 : index
    %c0_70 = arith.constant 0 : index
    %c0_71 = arith.constant 0 : index
    %155 = vector.load %arg16[%c0_69, %c0_70, %c0_71] : memref<1x32x128xf32, #tpu.memory_space<vmem>>, vector<1x32x128xf32>
    %156 = vector.shape_cast %155 : vector<1x32x128xf32> to vector<32x128xf32>
    %cst_72 = arith.constant dense<0.000000e+00> : vector<16x128xf32>
    %157 = tpu.matmul %154, %156, %cst_72 {dimension_numbers = #tpu.dot_dimension_numbers<[1], [0], [0], [1], [0, 0, 1, 1], [], []>} : vector<16x32xf32>, vector<32x128xf32>, vector<16x128xf32> -> vector<16x128xf32>
    %c0_73 = arith.constant 0 : index
    %c0_74 = arith.constant 0 : index
    %c0_75 = arith.constant 0 : index
    %158 = vector.load %arg17[%c0_73, %c0_74, %c0_75] : memref<1x1x128xf32, #tpu.memory_space<vmem>>, vector<1x1x128xf32>
    %159 = vector.shape_cast %158 : vector<1x1x128xf32> to vector<1x128xf32>
    %160 = vector.broadcast %159 : vector<1x128xf32> to vector<16x128xf32>
    %161 = arith.addf %157, %160 : vector<16x128xf32>
    %cst_76 = arith.constant 0.000000e+00 : f32
    %162 = vector.broadcast %cst_76 : f32 to vector<16x128xf32>
    %163 = arith.maximumf %161, %162 : vector<16x128xf32>
    %c0_77 = arith.constant 0 : index
    %c0_78 = arith.constant 0 : index
    %c0_79 = arith.constant 0 : index
    %164 = vector.load %arg18[%c0_77, %c0_78, %c0_79] : memref<1x128x32xf32, #tpu.memory_space<vmem>>, vector<1x128x32xf32>
    %165 = vector.shape_cast %164 : vector<1x128x32xf32> to vector<128x32xf32>
    %cst_80 = arith.constant dense<0.000000e+00> : vector<16x32xf32>
    %166 = tpu.matmul %163, %165, %cst_80 {dimension_numbers = #tpu.dot_dimension_numbers<[1], [0], [0], [1], [0, 0, 1, 1], [], []>} : vector<16x128xf32>, vector<128x32xf32>, vector<16x32xf32> -> vector<16x32xf32>
    %c0_81 = arith.constant 0 : index
    %c0_82 = arith.constant 0 : index
    %c0_83 = arith.constant 0 : index
    %167 = vector.load %arg19[%c0_81, %c0_82, %c0_83] : memref<1x1x32xf32, #tpu.memory_space<vmem>>, vector<1x1x32xf32>
    %168 = vector.shape_cast %167 : vector<1x1x32xf32> to vector<1x32xf32>
    %169 = vector.broadcast %168 : vector<1x32xf32> to vector<16x32xf32>
    %170 = arith.addf %166, %169 : vector<16x32xf32>
    %171 = arith.addf %154, %170 : vector<16x32xf32>
    %c0_84 = arith.constant 0 : index
    %c0_85 = arith.constant 0 : index
    %c0_86 = arith.constant 0 : index
    %172 = vector.load %arg20[%c0_84, %c0_85, %c0_86] : memref<1x1x32xf32, #tpu.memory_space<vmem>>, vector<1x1x32xf32>
    %173 = vector.shape_cast %172 : vector<1x1x32xf32> to vector<1x32xf32>
    %c0_87 = arith.constant 0 : index
    %c0_88 = arith.constant 0 : index
    %c0_89 = arith.constant 0 : index
    %174 = vector.load %arg21[%c0_87, %c0_88, %c0_89] : memref<1x1x32xf32, #tpu.memory_space<vmem>>, vector<1x1x32xf32>
    %175 = vector.shape_cast %174 : vector<1x1x32xf32> to vector<1x32xf32>
    %cst_90 = arith.constant dense<0.000000e+00> : vector<16xf32>
    %176 = vector.multi_reduction <add>, %171, %cst_90 [1] : vector<16x32xf32> to vector<16xf32>
    %177 = vector.shape_cast %176 : vector<16xf32> to vector<16x1xf32>
    %cst_91 = arith.constant 3.200000e+01 : f32
    %178 = vector.broadcast %cst_91 : f32 to vector<16x1xf32>
    %179 = arith.divf %177, %178 : vector<16x1xf32>
    %180 = vector.broadcast %179 : vector<16x1xf32> to vector<16x32xf32>
    %181 = arith.subf %171, %180 : vector<16x32xf32>
    %182 = arith.mulf %181, %181 : vector<16x32xf32>
    %cst_92 = arith.constant dense<0.000000e+00> : vector<16xf32>
    %183 = vector.multi_reduction <add>, %182, %cst_92 [1] : vector<16x32xf32> to vector<16xf32>
    %184 = vector.shape_cast %183 : vector<16xf32> to vector<16x1xf32>
    %cst_93 = arith.constant 3.200000e+01 : f32
    %185 = vector.broadcast %cst_93 : f32 to vector<16x1xf32>
    %186 = arith.divf %184, %185 : vector<16x1xf32>
    %187 = vector.broadcast %179 : vector<16x1xf32> to vector<16x32xf32>
    %188 = arith.subf %171, %187 : vector<16x32xf32>
    %cst_94 = arith.constant 9.99999974E-6 : f32
    %189 = vector.broadcast %cst_94 : f32 to vector<16x1xf32>
    %190 = arith.addf %186, %189 : vector<16x1xf32>
    %191 = math.rsqrt %190 : vector<16x1xf32>
    %192 = vector.broadcast %191 : vector<16x1xf32> to vector<16x32xf32>
    %193 = arith.mulf %188, %192 : vector<16x32xf32>
    %194 = vector.broadcast %173 : vector<1x32xf32> to vector<16x32xf32>
    %195 = arith.mulf %193, %194 : vector<16x32xf32>
    %196 = vector.broadcast %175 : vector<1x32xf32> to vector<16x32xf32>
    %197 = arith.addf %195, %196 : vector<16x32xf32>
    %c0_95 = arith.constant 0 : index
    %c0_96 = arith.constant 0 : index
    %198 = vector.load %arg25[%c0_95, %c0_96] : memref<16x32xf32, #tpu.memory_space<vmem>>, vector<16x32xf32>
    tpu.vector_store %arg25[%c0_95, %c0_96], %197 {strides = array<i32>} : memref<16x32xf32, #tpu.memory_space<vmem>>, vector<16x32xf32>,
    %c1_i32 = arith.constant 1 : i32
    %199 = arith.cmpi eq, %arg1, %c1_i32 : i32
    %200 = arith.extui %199 : i1 to i32
    %c0_i32_97 = arith.constant 0 : i32
    %201 = arith.cmpi ne, %200, %c0_i32_97 : i32
    scf.if %201 {
      %202 = vector.shape_cast %197 : vector<16x32xf32> to vector<2x8x32xf32>
      %203 = vector.extract_strided_slice %202 {offsets = [0, 7, 0], sizes = [2, 1, 32], strides = [1, 1, 1]} : vector<2x8x32xf32> to vector<2x1x32xf32>
      %204 = vector.shape_cast %203 : vector<2x1x32xf32> to vector<2x32xf32>
      %c0_98 = arith.constant 0 : index
      %c0_99 = arith.constant 0 : index
      %205 = vector.load %arg22[%c0_98, %c0_99] : memref<32x1xf32, #tpu.memory_space<vmem>>, vector<32x1xf32>
      %cst_100 = arith.constant dense<0.000000e+00> : vector<2x1xf32>
      %206 = tpu.matmul %204, %205, %cst_100 {dimension_numbers = #tpu.dot_dimension_numbers<[1], [0], [0], [1], [0, 0, 1, 1], [], []>} : vector<2x32xf32>, vector<32x1xf32>, vector<2x1xf32> -> vector<2x1xf32>
      %c0_101 = arith.constant 0 : index
      %c0_102 = arith.constant 0 : index
      %207 = vector.load %arg23[%c0_101, %c0_102] : memref<1x1xf32, #tpu.memory_space<vmem>>, vector<1x1xf32>
      %208 = vector.broadcast %207 : vector<1x1xf32> to vector<2x1xf32>
      %209 = arith.addf %206, %208 : vector<2x1xf32>
      %c0_103 = arith.constant 0 : index
      %c0_104 = arith.constant 0 : index
      %210 = vector.load %arg24[%c0_103, %c0_104] : memref<2x1xf32, #tpu.memory_space<vmem>>, vector<2x1xf32>
      tpu.vector_store %arg24[%c0_103, %c0_104], %209 {strides = array<i32>} : memref<2x1xf32, #tpu.memory_space<vmem>>, vector<2x1xf32>,
    } else {
    }
    return
  }
  func.func @transform_0(%arg0: i32, %arg1: i32) -> (i32, i32, i32) {
    %c0_i32 = arith.constant 0 : i32
    %c0_i32_0 = arith.constant 0 : i32
    %c0_i32_1 = arith.constant 0 : i32
    return %arg0, %c0_i32, %c0_i32_0 : i32, i32, i32
  }
  func.func @transform_1(%arg0: i32, %arg1: i32) -> (i32, i32) {
    %c0_i32 = arith.constant 0 : i32
    %c0_i32_0 = arith.constant 0 : i32
    %c0_i32_1 = arith.constant 0 : i32
    return %c0_i32, %c0_i32_0 : i32, i32
  }
  func.func @transform_2(%arg0: i32, %arg1: i32) -> (i32, i32) {
    %c0_i32 = arith.constant 0 : i32
    %c0_i32_0 = arith.constant 0 : i32
    %c0_i32_1 = arith.constant 0 : i32
    return %c0_i32, %c0_i32_0 : i32, i32
  }
  func.func @transform_3(%arg0: i32, %arg1: i32) -> (i32, i32) {
    %c0_i32 = arith.constant 0 : i32
    %c0_i32_0 = arith.constant 0 : i32
    %c0_i32_1 = arith.constant 0 : i32
    return %c0_i32, %c0_i32_0 : i32, i32
  }
  func.func @transform_4(%arg0: i32, %arg1: i32) -> (i32, i32, i32) {
    %c0_i32 = arith.constant 0 : i32
    %c0_i32_0 = arith.constant 0 : i32
    %c0_i32_1 = arith.constant 0 : i32
    return %arg1, %c0_i32, %c0_i32_0 : i32, i32, i32
  }
  func.func @transform_5(%arg0: i32, %arg1: i32) -> (i32, i32, i32) {
    %c0_i32 = arith.constant 0 : i32
    %c0_i32_0 = arith.constant 0 : i32
    %c0_i32_1 = arith.constant 0 : i32
    return %arg1, %c0_i32, %c0_i32_0 : i32, i32, i32
  }
  func.func @transform_6(%arg0: i32, %arg1: i32) -> (i32, i32, i32) {
    %c0_i32 = arith.constant 0 : i32
    %c0_i32_0 = arith.constant 0 : i32
    %c0_i32_1 = arith.constant 0 : i32
    return %arg1, %c0_i32, %c0_i32_0 : i32, i32, i32
  }
  func.func @transform_7(%arg0: i32, %arg1: i32) -> (i32, i32, i32) {
    %c0_i32 = arith.constant 0 : i32
    %c0_i32_0 = arith.constant 0 : i32
    %c0_i32_1 = arith.constant 0 : i32
    return %arg1, %c0_i32, %c0_i32_0 : i32, i32, i32
  }
  func.func @transform_8(%arg0: i32, %arg1: i32) -> (i32, i32, i32) {
    %c0_i32 = arith.constant 0 : i32
    %c0_i32_0 = arith.constant 0 : i32
    %c0_i32_1 = arith.constant 0 : i32
    return %arg1, %c0_i32, %c0_i32_0 : i32, i32, i32
  }
  func.func @transform_9(%arg0: i32, %arg1: i32) -> (i32, i32, i32) {
    %c0_i32 = arith.constant 0 : i32
    %c0_i32_0 = arith.constant 0 : i32
    %c0_i32_1 = arith.constant 0 : i32
    return %arg1, %c0_i32, %c0_i32_0 : i32, i32, i32
  }
  func.func @transform_10(%arg0: i32, %arg1: i32) -> (i32, i32, i32) {
    %c0_i32 = arith.constant 0 : i32
    %c0_i32_0 = arith.constant 0 : i32
    %c0_i32_1 = arith.constant 0 : i32
    return %arg1, %c0_i32, %c0_i32_0 : i32, i32, i32
  }
  func.func @transform_11(%arg0: i32, %arg1: i32) -> (i32, i32, i32) {
    %c0_i32 = arith.constant 0 : i32
    %c0_i32_0 = arith.constant 0 : i32
    %c0_i32_1 = arith.constant 0 : i32
    return %arg1, %c0_i32, %c0_i32_0 : i32, i32, i32
  }
  func.func @transform_12(%arg0: i32, %arg1: i32) -> (i32, i32, i32) {
    %c0_i32 = arith.constant 0 : i32
    %c0_i32_0 = arith.constant 0 : i32
    %c0_i32_1 = arith.constant 0 : i32
    return %arg1, %c0_i32, %c0_i32_0 : i32, i32, i32
  }
  func.func @transform_13(%arg0: i32, %arg1: i32) -> (i32, i32, i32) {
    %c0_i32 = arith.constant 0 : i32
    %c0_i32_0 = arith.constant 0 : i32
    %c0_i32_1 = arith.constant 0 : i32
    return %arg1, %c0_i32, %c0_i32_0 : i32, i32, i32
  }
  func.func @transform_14(%arg0: i32, %arg1: i32) -> (i32, i32, i32) {
    %c0_i32 = arith.constant 0 : i32
    %c0_i32_0 = arith.constant 0 : i32
    %c0_i32_1 = arith.constant 0 : i32
    return %arg1, %c0_i32, %c0_i32_0 : i32, i32, i32
  }
  func.func @transform_15(%arg0: i32, %arg1: i32) -> (i32, i32, i32) {
    %c0_i32 = arith.constant 0 : i32
    %c0_i32_0 = arith.constant 0 : i32
    %c0_i32_1 = arith.constant 0 : i32
    return %arg1, %c0_i32, %c0_i32_0 : i32, i32, i32
  }
  func.func @transform_16(%arg0: i32, %arg1: i32) -> (i32, i32, i32) {
    %c0_i32 = arith.constant 0 : i32
    %c0_i32_0 = arith.constant 0 : i32
    %c0_i32_1 = arith.constant 0 : i32
    return %arg1, %c0_i32, %c0_i32_0 : i32, i32, i32
  }
  func.func @transform_17(%arg0: i32, %arg1: i32) -> (i32, i32, i32) {
    %c0_i32 = arith.constant 0 : i32
    %c0_i32_0 = arith.constant 0 : i32
    %c0_i32_1 = arith.constant 0 : i32
    return %arg1, %c0_i32, %c0_i32_0 : i32, i32, i32
  }
  func.func @transform_18(%arg0: i32, %arg1: i32) -> (i32, i32, i32) {
    %c0_i32 = arith.constant 0 : i32
    %c0_i32_0 = arith.constant 0 : i32
    %c0_i32_1 = arith.constant 0 : i32
    return %arg1, %c0_i32, %c0_i32_0 : i32, i32, i32
  }
  func.func @transform_19(%arg0: i32, %arg1: i32) -> (i32, i32, i32) {
    %c0_i32 = arith.constant 0 : i32
    %c0_i32_0 = arith.constant 0 : i32
    %c0_i32_1 = arith.constant 0 : i32
    return %arg1, %c0_i32, %c0_i32_0 : i32, i32, i32
  }
  func.func @transform_20(%arg0: i32, %arg1: i32) -> (i32, i32) {
    %c0_i32 = arith.constant 0 : i32
    %c0_i32_0 = arith.constant 0 : i32
    %c0_i32_1 = arith.constant 0 : i32
    return %c0_i32, %c0_i32_0 : i32, i32
  }
  func.func @transform_21(%arg0: i32, %arg1: i32) -> (i32, i32) {
    %c0_i32 = arith.constant 0 : i32
    %c0_i32_0 = arith.constant 0 : i32
    %c0_i32_1 = arith.constant 0 : i32
    return %c0_i32, %c0_i32_0 : i32, i32
  }
  func.func @transform_22(%arg0: i32, %arg1: i32) -> (i32, i32) {
    %c0_i32 = arith.constant 0 : i32
    %c0_i32_0 = arith.constant 0 : i32
    return %arg0, %c0_i32 : i32, i32
  }
}

</mosaic_0001>

<bundles_post_ra>
// kernel: tpu_custom_call.1
= control target key start
LH: loop header
LB: loop body
LE: loop exit
PB: predicated region body
PF: predicated region fallthrough
CT: control target
= control target key end

     0   :  { %s3285_s0 = inlined_call_operand.vmem [shape: f32[2,8,8], index: 0, kind: input, shape index: {}]   ;;  %s3286_s1 = inlined_call_operand.hbm [shape: f32[8,32], index: 1, kind: input, shape index: {}]   ;;  %s3287_s2 = inlined_call_operand.vmem [shape: f32[1,32], index: 2, kind: input, shape index: {}]   ;;  %s3288_s3 = inlined_call_operand.vmem [shape: f32[16,32], index: 3, kind: input, shape index: {}]   ;;  %s3289_s4 = inlined_call_operand.vmem [shape: f32[2,32,32], index: 4, kind: input, shape index: {}]   ;;  %s3290_s5 = inlined_call_operand.vmem [shape: f32[2,1,32], index: 5, kind: input, shape index: {}]   ;;  %s3291_s6 = inlined_call_operand.vmem [shape: f32[2,32,32], index: 6, kind: input, shape index: {}]   ;;  %s3292_s7 = inlined_call_operand.vmem [shape: f32[2,1,32], index: 7, kind: input, shape index: {}]   ;;  %s3293_s8 = inlined_call_operand.vmem [shape: f32[2,32,32], index: 8, kind: input, shape index: {}]   ;;  %s3294_s9 = inlined_call_operand.vmem [shape: f32[2,1,32], index: 9, kind: input, shape index: {}]   ;;  %s3295_s10 = inlined_call_operand.vmem [shape: f32[2,32,32], index: 10, kind: input, shape index: {}]   ;;  %s3296_s11 = inlined_call_operand.vmem [shape: f32[2,1,32], index: 11, kind: input, shape index: {}]   ;;  %s3297_s12 = inlined_call_operand.vmem [shape: f32[2,1,32], index: 12, kind: input, shape index: {}]   ;;  %s3298_s13 = inlined_call_operand.hbm [shape: f32[2,1,32], index: 13, kind: input, shape index: {}]   ;;  %s3299_s14 = inlined_call_operand.vmem [shape: f32[2,32,128], index: 14, kind: input, shape index: {}]   ;;  %s3300_s15 = inlined_call_operand.vmem [shape: f32[2,1,128], index: 15, kind: input, shape index: {}]   ;;  %s3301_s16 = inlined_call_operand.vmem [shape: f32[2,128,32], index: 16, kind: input, shape index: {}]   ;;  %s3302_s17 = inlined_call_operand.vmem [shape: f32[2,1,32], index: 17, kind: input, shape index: {}]   ;;  %s3303_s18 = inlined_call_operand.vmem [shape: f32[2,1,32], index: 18, kind: input, shape index: {}]   ;;  %s3304_s19 = inlined_call_operand.vmem [shape: f32[2,1,32], index: 19, kind: input, shape index: {}]   ;;  %s3305_s20 = inlined_call_operand.vmem [shape: f32[32,1], index: 20, kind: input, shape index: {}]   ;;  %s3306_s21 = inlined_call_operand.<no memory space> [shape: f32[1,1], index: 21, kind: input, shape index: {}]   ;;  %s3307_s22 = inlined_call_operand.vmem [shape: f32[2,1], index: 22, kind: output, shape index: {}]  }
   0x1   :  { %3316 = sst [smem:[#allocation17_spill]] %s3285_s0  ;;  %v27_v0 = vstv %s3306_s21 }
   0x2   :  { %3317 = sst [smem:[#allocation18_spill]] %s3286_s1  ;;  %28 = vst [vmem:[#allocation3] sm:$0x1] %v27_v0 }
   0x3   :  { %3318 = sst [smem:[#allocation19_spill]] %s3287_s2 }
   0x4   :  { %3319 = sst [smem:[#allocation20_spill]] %s3288_s3 }
   0x5   :  { %3320 = sst [smem:[#allocation21_spill]] %s3289_s4 }
   0x6   :  { %3321 = sst [smem:[#allocation22_spill]] %s3290_s5 }
   0x7   :  { %3322 = sst [smem:[#allocation23_spill]] %s3291_s6 }
   0x8   :  { %3323 = sst [smem:[#allocation24_spill]] %s3293_s8 }
   0x9   :  { %3324 = sst [smem:[#allocation25_spill]] %s3295_s10 }
   0xa   :  { %3325 = sst [smem:[#allocation26_spill]] %s3297_s12 }
   0xb   :  { %3326 = sst [smem:[#allocation27_spill]] %s3298_s13 }
   0xc   :  { %3327 = sst [smem:[#allocation28_spill]] %s3299_s14 }
   0xd   :  { %3328 = sst [smem:[#allocation29_spill]] %s3303_s18 }
   0xe   :  { %3329 = sst [smem:[#allocation30_spill]] %s3304_s19 }
   0xf   :  { %3330 = sst [smem:[#allocation31_spill]] %s3305_s20 }
  0x10   :  { %3331 = sst [smem:[#allocation32_spill]] %s3307_s22 }
  0x11   :  { %29 = vsyncpa [#allocation5], 0 }
  0x12   :  { %30 = vsyncpa [#allocation7], 0 }
  0x13   :  { %32 = vsyncpa [#allocation7 + $0x1], 0  ;;  %s2838_s29 = smov 0   ;;  %s2840_s30 = smov 0  }
  0x14   :  { %s2842_s4 = smov 0   ;;  %s2844_s0 = smov 0  }
  0x15   :  { %s2846_s23 = smov 0   ;;  %s2848_s1 = smov 0  }
  0x16 LB: > { %3332 = sst [smem:[#allocation10_spill]] %s2697_s30  ;;  %s2396_s21 = sadd.s32 4294967295, %s2713_s1   ;;  %s2713_s1 = sphi %s2848_s1, %s38_s1   ;;  %s2709_s23 = sphi %s2846_s23, %s3375_s23   ;;  %s2705_s0 = sphi %s2844_s0, %s3374_s0   ;;  %s2701_s4 = sphi %s2842_s4, %s3373_s4   ;;  %s2697_s30 = sphi %s2840_s30, %s3372_s30   ;;  %s2693_s29 = sphi %s2838_s29, %s3371_s29  }
  0x17   : > { %3333 = sst [smem:[#allocation11_spill]] %s2701_s4  ;;  %p393_p0 = scmp.ne.s32.totalorder %s2697_s30, %s2693_s29 }
  0x18   : > { %3334 = sst [smem:[#allocation12_spill]] %s2709_s23  ;;  %p2868_p1 = scmp.eq.s32.totalorder %s2396_s21, 0 }
  0x19   : > { %3335 = sst [smem:[#allocation13_spill]] %s2713_s1  ;;  %p2397_p2 = scmp.ge.s32.totalorder %s2713_s1, 1 }
  0x1a   : > { %p628_p3 = scmp.lt.s32.totalorder %s2713_s1, 3  ;;  %p2876_p4 = por %p2868_p1, %p393_p0 }
  0x1b   : > { %s3338_s26 = sld [smem:[#allocation18_spill]]  ;;  %s2715_s3 = smov [#allocation4]  }
  0x1c   : > { %p2883_p5 = pnand %p2397_p2, %p628_p3  ;;  %s651_s28 = sshll.u32 %s2715_s3, 4  ;;  %s652_s28 = int_to_ptr.vmem [resolvable:$true] %s651_s28 }
  0x1d   : > { %s47_s29 = sadd.s32 1, %s2709_s23  ;;  %p387_p9 = scmp.ne.s32.totalorder %s2701_s4, %s2697_s30 }
  0x1e   : > { %p2476_p6 = pneg %p2883_p5  ;;  %p48_p8 = scmp.ge.s32.totalorder %s47_s29, 2 }
  0x1f   : > { %p388_p10 = scmp.eq.s32.totalorder %s2713_s1, 0  ;;  %s380_s21 = sadd.s32 1, %s2701_s4 }
  0x20   : > { %p2477_p7 = pnand %p2476_p6, %p2868_p1  ;;  %s3377_s29 = smov (%p48_p8, %s47_s29), 0 }
  0x21   : > { %s649_s2 = sshll.u32 %s3338_s26, 4  ;;  %3340 = sst [smem:[#allocation14_spill]] %s3377_s29  ;;  %s650_s2 = int_to_ptr.hbm [resolvable:$true] %s649_s2 }
  0x22   : > { %2479 = dma.hbm_to_vmem [thread:$0]  (!%p2477_p7), %s650_s2, 128, %s652_s28, [#allocation5]  }
  0x23   : > { %p389_p11 = por %p388_p10, %p387_p9  ;;  %s377_s6 = ssub.s32 %s2709_s23, %s3377_s29 }
  0x24   : > { %s736_s25 = sand.u32 1, %s2701_s4   ;;  %p378_p12 = scmp.eq.s32.totalorder %s377_s6, 0 }
  0x25   : > { %p2485_p13 = scmp.lt.s32.totalorder %s2713_s1, 2  ;;  %s3341_s13 = sld [smem:[#allocation27_spill]] }
  0x26   : > { %s2907_s20 = scalar_select %p378_p12, %s2701_s4, %s380_s21  }
  0x27   : > { %s739_s2 = scalar_lea.vmem [#allocation6], %s736_s25  ;;  %p2481_p0 = pnand %p2485_p13, %p389_p11 }
  0x28   : > { %3342 = sst [smem:[#allocation15_spill]] %s2907_s20  ;;  %s746_s28 = sshll.u32 %s739_s2, 4  ;;  %s747_s28 = int_to_ptr.vmem [resolvable:$true] %s746_s28 }
  0x29   : > { %s737_s18 = scalar_lea.sflag [#allocation7], %s736_s25  ;;  %795 = sbr.rel (%p2883_p5) target bundleno = 2892 (0xb4c), region = 108 }
  0x2b   : > { %s742_s22 = scalar_lea.hbm %s3341_s13, %s2709_s23 }
  0x2c   : > { %s744_s19 = sshll.u32 %s742_s22, 4  ;;  %s745_s19 = int_to_ptr.hbm [resolvable:$true] %s744_s19 }
  0x2d   : > { %2483 = dma.hbm_to_vmem [thread:$0]  (!%p2481_p0), %s745_s19, 16, %s747_s28, %s737_s18  }
  0x2e   : > { %2684 = dma.done.wait (%p2868_p1), [#allocation5], 128  }
  0x2f   : > { %2686 = vsyncadd (%p2868_p1), [#allocation5], 4294967168  ;;  %s802_s21 = sand.u32 1, %s2697_s30  }
  0x30   : > { %s803_s22 = scalar_lea.sflag [#allocation7], %s802_s21  ;;  %s2916_s6 = scalar_lea.vmem [#allocation6], %s802_s21 }
  0x31   : > { %3343 = sst [smem:[#allocation16_spill]] %s2916_s6 }
  0x32   : > { %2688 = dma.done.wait (%p2876_p4), %s803_s22, 16  }
  0x33   : > { %2690 = vsyncadd (%p2876_p4), %s803_s22, 4294967280  ;;  %p933_p2 = scmp.lt.s32.totalorder %s2705_s0, 1  ;;  %s3345_s2 = sld [smem:[#allocation21_spill]] }
  0x34   : > { %s3346_s13 = sld [smem:[#allocation23_spill]]  ;;  %p2415_p1 = scmp.ne.s32.totalorder %s2705_s0, 0 }
  0x35   : > { %s2924_s18 = scalar_select %p933_p2, %s2705_s0, 1 }
  0x36   : > { %s3347_s8 = sld [smem:[#allocation24_spill]] }
  0x37   : > { %s2463_s19 = sshll.u32 %s2924_s18, 5  ;;  %s3348_s10 = sld [smem:[#allocation25_spill]] }
  0x38   : > { %s3350_s14 = sld [smem:[#allocation28_spill]]  ;;  %s975_s26 = scalar_lea.vmem %s3300_s15, %s2924_s18 }
  0x39   : > { %s2934_s28 = scalar_lea.vmem %s3345_s2, %s2463_s19  ;;  %s2468_s3 = sshll.u32 %s2924_s18, 7 }
  0x3a   : > { %s2939_s29 = scalar_lea.vmem %s3346_s13, %s2463_s19  ;;  %s983_s6 = scalar_lea.vmem %s3302_s17, %s2924_s18 }
  0x3b   : > { %s2984_s22 = scalar_lea.vmem %s3301_s16, %s2468_s3  ;;  %s3351_s4 = sld [smem:[#allocation29_spill]] }
  0x3c   : > { %s2948_s5 = scalar_lea.vmem %s3347_s8, %s2463_s19  ;;  %s3353_s24 = sld [smem:[#allocation17_spill]] (!%p2415_p1) }
  0x3d   : > { %s2957_s25 = scalar_lea.vmem %s3348_s10, %s2463_s19  ;;  %s3355_s23 = sld [smem:[#allocation20_spill]] (!%p2415_p1) }
  0x3e   : > { %s2970_s8 = scalar_lea.vmem %s3350_s14, %s2463_s19  ;;  %s3352_s14 = sld [smem:[#allocation30_spill]] }
  0x40   : > { %997 = sbr.rel (%p2415_p1) target bundleno = 203 (0xcb), region = 120 }
  0x41   : > { %s986_s30 = scalar_lea.vmem %s3351_s4, %s2924_s18 }
  0x43   : > { %s3356_s19 = smov (!%p2415_p1), %s3355_s23 }
  0x44   : > { %s989_s12 = scalar_lea.vmem %s3352_s14, %s2924_s18  ;;  %s3354_s14 = sld [smem:[#allocation19_spill]] (!%p2415_p1) }
  0x45   : > { %v1000_v1 = vld [vmem:[#allocation4] sm:$0xff]  ;;  %v998_v2 = vld [vmem:[%s3353_s24] sm:$0xff]  ;;  %vm1005_vm0 = vcmask 64512   ;;  %v999_v3 = vld [vmem:[%s3353_s24 + $0x8] sm:$0xff]  ;;  %vm1039_vm1 = vcmask 261120  }
  0x46   : > { %1027 = vmatpush.msra.mxu0 %v1000_v1  ;;  %2469 = vmatpush.msra.mxu1 %v1000_v1  ;;  %v1035_v6 = vld [vmem:[%s3355_s23] sm:$0xff]  ;;  %v1036_v8 = vld [vmem:[%s3356_s19 + $0x8] sm:$0xff] }
  0x47   : > { %2416 = vmatmul.msk.f32.vlgmr.msra.gmra.mxu0 %vm1005_vm0, %v998_v2  ;;  %2417 = vmatmul.msk.f32.vlgmr.msra.gmra.mxu1 %vm1005_vm0, %v999_v3 }
  0x4a   : > { %v2540_v4 = vld [vmem:[%s3354_s14] ss:$0 sm:$0xff] }
  0xc4   : > { %v1029_v5 = vpop.f32.mrf.mxu0  ;;  %v1032_v7 = vpop.f32.mrf.mxu1 }
  0xc5   : > { %v1030_v9 = vadd.f32 %v2540_v4, %v1029_v5  ;;  %v1033_v10 = vadd.f32 %v2540_v4, %v1032_v7 }
  0xc7   : > { %v1037_v11 = vadd.f32 %v1035_v6, %v1030_v9  ;;  %v1038_v12 = vadd.f32 %v1036_v8, %v1033_v10 }
  0xc9   : > { %1040 = vst.msk [vmem:[#allocation2] sm:$0xff] %vm1039_vm1, %v1037_v11 }
  0xca   : > { %1041 = vst.msk [vmem:[#allocation2 + $0x8] sm:$0xff] %vm1039_vm1, %v1038_v12 }
  0xcb PF: > { %v1085_v13 = vld [vmem:[%s2939_s29 + $0x18] sm:$0xff]  ;;  %v1084_v14 = vld [vmem:[%s2939_s29 + $0x10] sm:$0xff]  ;;  %v1083_v16 = vld [vmem:[%s2939_s29 + $0x8] sm:$0xff]  ;;  %vm1052_vm2 = vcmask 261120   ;;  %s3357_s10 = scalar_lea.vmem %s3292_s7, %s2924_s18  ;;  %s3358_s4 = sld [smem:[#allocation22_spill]]  ;;  %vm1145_vm3 = vcmask 64512  }
  0xcc   : > { %1102 = vmatpush.msra.mxu2 %v1085_v13  ;;  %v1047_v15 = vld [vmem:[%s2934_s28 + $0x18] sm:$0xff]  ;;  %v1082_v17 = vld [vmem:[%s2939_s29] sm:$0xff]  ;;  %v1046_v18 = vld [vmem:[%s2934_s28 + $0x10] sm:$0xff]  ;;  %s3360_s20 = scalar_lea.vmem %s3294_s9, %s2924_s18  ;;  %s2717_s23 = smov 112  }
  0xcd   : > { %1071 = vmatpush.msra.mxu0 %v1047_v15  ;;  %v1045_v20 = vld [vmem:[%s2934_s28 + $0x8] sm:$0xff]  ;;  %v1044_v21 = vld [vmem:[%s2934_s28] sm:$0xff]  ;;  %v1116_v23 = vld [vmem:[%s2948_s5 + $0x18] sm:$0xff]  ;;  %s2718_s1 = smov 104   ;;  %s3361_s29 = scalar_lea.vmem %s3296_s11, %s2924_s18 }
  0xce   : > { %1103 = vmatpush.msra.mxu2 %v1084_v14  ;;  %v1115_v24 = vld [vmem:[%s2948_s5 + $0x10] sm:$0xff]  ;;  %v1114_v25 = vld [vmem:[%s2948_s5 + $0x8] sm:$0xff]  ;;  %v1113_v26 = vld [vmem:[%s2948_s5] sm:$0xff]  ;;  %s2716_s5 = smov 120   ;;  %s3363_s2 = sld [smem:[#allocation26_spill]] }
  0xcf   : > { %1072 = vmatpush.msra.mxu0 %v1046_v18  ;;  %v2546_v27 = vld [vmem:[%s3357_s10] ss:$0 sm:$0xff]  ;;  %p2458_p3 = scmp.ne.s32.totalorder %s2705_s0, 1 }
  0xd0   : > { %v3016_v19 = vld [vmem:[#allocation2] sm:$0xff]  ;;  %1104 = vmatpush.msra.mxu2 %v1083_v16 }
  0xd1   : > { %1073 = vmatpush.msra.mxu0 %v1045_v20  ;;  %v3024_v22 = vld [vmem:[#allocation2 + $0x8] sm:$0xff]  ;;  %s3359_s13 = scalar_lea.vmem %s3358_s4, %s2924_s18  ;;  %v2548_v38 = vld [vmem:[%s3360_s20] ss:$0 sm:$0xff] }
  0xd2   : > { %1105 = vmatpush.msra.mxu2 %v1082_v17  ;;  %v2547_v29 = vld [vmem:[%s3359_s13] ss:$0 sm:$0xff] }
  0xd3   : > { %2420 = vmatmul.msk.f32.vlgmr.msra.gmra.mxu2 %vm1052_vm2, %v3016_v19  ;;  %1074 = vmatpush.msra.mxu0 %v1044_v21 }
  0xd4   : > { %2418 = vmatmul.msk.f32.vlgmr.msra.gmra.mxu0 %vm1052_vm2, %v3016_v19  ;;  %1133 = vmatpush.msrb.mxu2 %v1116_v23  ;;  %s3364_s3 = scalar_lea.vmem %s3363_s2, %s2924_s18 }
  0xd6   : > { %1134 = vmatpush.msrb.mxu2 %v1115_v24 }
  0xd8   : > { %1135 = vmatpush.msrb.mxu2 %v1114_v25 }
  0xda   : > { %1136 = vmatpush.msrb.mxu2 %v1113_v26 }
  0xdb   : > { %2421 = vmatmul.msk.f32.gmra.mxu2 %vm1052_vm2, %v3024_v22 }
  0xdc   : > { %2419 = vmatmul.msk.f32.gmra.mxu0 %vm1052_vm2, %v3024_v22 }
  0xe3   : > { %2422 = vmatmul.msk.f32.vlgmr.msrb.gmra.mxu2 %vm1052_vm2, %v3016_v19 }
  0xeb   : > { %2423 = vmatmul.msk.f32.gmra.mxu2 %vm1052_vm2, %v3024_v22 }
 0x151   : > { %v1076_v28 = vpop.f32.mrf.mxu0 }
 0x152   : > { %v3050_v32 = vadd.f32 %v2547_v29, %v1076_v28 }
 0x156   : > { %v1107_v30 = vpop.f32.mrf.mxu2 }
 0x157   : > { %v3048_v31 = vadd.f32 %v2546_v27, %v1107_v30 }
 0x159   : > { %1331 = vrot.lane.b32.xlu0 %v3048_v31, %s2716_s5  ;;  %2424 = vmatpush.xpose.msk.msra.mxu3 %vm1145_vm3, %v3048_v31  ;;  %v1079_v33 = vpop.f32.mrf.mxu0 }
 0x15a   : > { %v3060_v36 = vadd.f32 %v2547_v29, %v1079_v33 }
 0x15c   : > { %2425 = vmatmul.msk.f32.vlgmr.msra.gmra.mxu3 %vm1145_vm3, %v3050_v32 }
 0x15e   : > { %v1110_v34 = vpop.f32.mrf.mxu2 }
 0x15f   : > { %v3058_v35 = vadd.f32 %v2546_v27, %v1110_v34 }
 0x161   : > { %2426 = vmatpush.xpose.msk.msrb.mxu3 %vm1145_vm3, %v3058_v35  ;;  %1329 = vrot.lane.b32.xlu0 %v3050_v32, %s2716_s5 }
 0x162   : > { %1359 = vrot.lane.b32.xlu2 %v3058_v35, %s2716_s5 }
 0x164   : > { %2427 = vmatmul.msk.f32.vlgmr.msrb.gmra.mxu3 %vm1145_vm3, %v3060_v36 }
 0x166   : > { %v1138_v39 = vpop.f32.mrf.mxu2 }
 0x167   : > { %v3078_v40 = vadd.f32 %v2548_v38, %v1138_v39 }
 0x169   : > { %1266 = vmatpush.msra.mxu3 %v3078_v40 }
 0x16a   : > { %1357 = vrot.lane.b32.xlu2 %v3060_v36, %s2716_s5 }
 0x16e   : > { %v1141_v43 = vpop.f32.mrf.mxu2 }
 0x16f   : > { %v3083_v44 = vadd.f32 %v2548_v38, %v1141_v43 }
 0x171   : > { %1289 = vmatpush.msrb.mxu0 %v3083_v44 }
 0x1bc   : > { %v1360_v41 = vpop.permute.xlu2 %1359 }
 0x1bd   : > { %2434 = vmatpush.xpose.msk.msrb.mxu3 %vm1145_vm3, %v1360_v41 }
 0x1c4   : > { %v1358_v0 = vpop.permute.xlu2 %1357 }
 0x1cb   : > { %v1332_v37 = vpop.permute.xlu0 %1331 }
 0x1cc   : > { %2432 = vmatpush.xpose.msk.msra.mxu2 %vm1145_vm3, %v1332_v37  ;;  %v1294_v37 = vld [vmem:[%s2957_s25] sm:$0xff] }
 0x1cd   : > { %1316 = vmatpush.msra.mxu1 %v1294_v37 }
 0x1d3   : > { %v1330_v42 = vpop.permute.xlu0 %1329 }
 0x1d4   : > { %2433 = vmatmul.msk.f32.vlgmr.msra.gmra.mxu2 %vm1145_vm3, %v1330_v42 }
 0x1df   : > { %v1169_v45 = vpop.f32.mrf.mxu3 }
 0x1e0   : > { %v1198_v46 = vmul.f32 0.35355338, %v1169_v45 }
 0x1e2   : > { %v1200_v47 = vsel %vm1145_vm3, %v1198_v46, -inf }
 0x1e3   : > { %1201 = vmax.xlane.f32.xlu1 %v1200_v47 }
 0x1e7   : > { %v1195_v48 = vpop.f32.mrf.mxu3 }
 0x1e8   : > { %v1199_v49 = vmul.f32 0.35355338, %v1195_v48 }
 0x1ea   : > { %v1203_v50 = vsel %vm1145_vm3, %v1199_v49, -inf }
 0x1eb   : > { %1204 = vmax.xlane.f32.xlu0 %v1203_v50 }
 0x256   : > { %v1202_v51 = vpop.xlane.xlu1 %1201 }
 0x257   : > { %v1206_v52 = vsub.f32 %v1198_v46, %v1202_v51  ;;  %v1354_v59 = vpop.f32.mrf.mxu2 }
 0x258   : > { %v1385_v60 = vmul.f32 0.35355338, %v1354_v59  ;;  %v1489_v59 = vld [vmem:[%s2957_s25 + $0x8] sm:$0xff] }
 0x259   : > { %v1208_v53 = vmul.f32 1.442695, %v1206_v52 }
 0x25a   : > { %v1387_v62 = vsel %vm1145_vm3, %v1385_v60, -inf }
 0x25b   : > { %2556 = vpow2.f32 %v1208_v53 }
 0x25e   : > { %v1205_v54 = vpop.xlane.xlu0 %1204 }
 0x25f   : > { %v1207_v55 = vsub.f32 %v1199_v49, %v1205_v54 }
 0x261   : > { %v2557_v56 = vpop.eup %2556  ;;  %v1210_v57 = vmul.f32 1.442695, %v1207_v55 }
 0x262   : > { %v1212_v58 = vsel %vm1145_vm3, %v2557_v56, 0.0 }
 0x263   : > { %2558 = vpow2.f32 %v1210_v57  ;;  %1213 = vadd.xlane.f32.xlu1 %v1212_v58 }
 0x269   : > { %v2559_v61 = vpop.eup %2558 }
 0x26a   : > { %v1215_v63 = vsel %vm1145_vm3, %v2559_v61, 0.0 }
 0x26b   : > { %1388 = vmax.xlane.f32.xlu1 %v1387_v62  ;;  %1216 = vadd.xlane.f32.xlu2 %v1215_v63 }
 0x283   : > { %1521 = vrot.lane.b32.xlu2 %v3050_v32, %s2717_s23 }
 0x284   : > { %1436 = vrot.lane.b32.xlu1 %v3078_v40, %s2716_s5 }
 0x2d6   : > { %v1214_v1 = vpop.xlane.xlu1 %1213 }
 0x2d7   : > { %2560 = vrcp.f32 %v1214_v1  ;;  %v1229_v8 = vand.u32 2147483648, %v1214_v1  ;;  %v1227_v11 = vand.u32 2147483647, %v1214_v1  ;;  %vm1223_vm5 = vweird.f32 %v1214_v1 }
 0x2d9   : > { %v1230_v14 = vor.u32 1.1754944e-38, %v1229_v8  ;;  %vm1228_vm7 = vcmp.eq.f32.partialorder %v1227_v11, 8.507059e+37 }
 0x2dd   : > { %v2561_v2 = vpop.eup %2560 }
 0x2de   : > { %v1219_v3 = vmul.f32 %v2561_v2, %v1214_v1  ;;  %v1389_v4 = vpop.xlane.xlu1 %1388  ;;  %v1217_v5 = vpop.xlane.xlu2 %1216  ;;  %vm1224_vm4 = vweird.f32 %v2561_v2 }
 0x2df   : > { %v1393_v6 = vsub.f32 %v1385_v60, %v1389_v4  ;;  %2562 = vrcp.f32 %v1217_v5  ;;  %vm1225_vm6 = vmor %vm1223_vm5, %vm1224_vm4  ;;  %v1243_v23 = vand.u32 2147483648, %v1217_v5  ;;  %v1241_v25 = vand.u32 2147483647, %v1217_v5 }
 0x2e0   : > { %v1220_v7 = vsub.f32 1.0, %v1219_v3  ;;  %vm1237_vm9 = vweird.f32 %v1217_v5 }
 0x2e1   : > { %v1395_v9 = vmul.f32 1.442695, %v1393_v6  ;;  %v1244_v28 = vor.u32 1.1754944e-38, %v1243_v23  ;;  %vm1242_vm11 = vcmp.eq.f32.partialorder %v1241_v25, 8.507059e+37 }
 0x2e2   : > { %v1221_v10 = vmul.f32 %v2561_v2, %v1220_v7 }
 0x2e3   : > { %2564 = vpow2.f32 %v1395_v9 }
 0x2e4   : > { %v1222_v12 = vadd.f32 %v2561_v2, %v1221_v10 }
 0x2e5   : > { %v2563_v13 = vpop.eup %2562 }
 0x2e6   : > { %v1226_v15 = vsel %vm1225_vm6, %v2561_v2, %v1222_v12  ;;  %v1233_v16 = vmul.f32 %v2563_v13, %v1217_v5  ;;  %vm1238_vm8 = vweird.f32 %v2563_v13  ;;  %v1522_v58 = vpop.permute.xlu2 %1521 }
 0x2e7   : > { %v1231_v17 = vsel %vm1228_vm7, %v1230_v14, %v1226_v15  ;;  %vm1239_vm10 = vmor %vm1237_vm9, %vm1238_vm8 }
 0x2e8   : > { %v1234_v18 = vsub.f32 1.0, %v1233_v16  ;;  %v1246_v20 = vmul.f32 %v2557_v56, %v1231_v17 }
 0x2e9   : > { %v2565_v21 = vpop.eup %2564 }
 0x2ea   : > { %v1235_v24 = vmul.f32 %v2563_v13, %v1234_v18  ;;  %2428 = vmatmul.msk.f32.vlgmr.msra.gmra.mxu3 %vm1145_vm3, %v1246_v20  ;;  %v1399_v26 = vsel %vm1145_vm3, %v2565_v21, 0.0 }
 0x2eb   : > { %1400 = vadd.xlane.f32.xlu1 %v1399_v26  ;;  %1511 = vmatpush.msra.mxu3 %v1489_v59 }
 0x2ec   : > { %v1236_v27 = vadd.f32 %v2563_v13, %v1235_v24 }
 0x2ee   : > { %v1240_v29 = vsel %vm1239_vm10, %v2563_v13, %v1236_v27 }
 0x2ef   : > { %v1245_v30 = vsel %vm1242_vm11, %v1244_v28, %v1240_v29 }
 0x2f0   : > { %v1247_v33 = vmul.f32 %v2559_v61, %v1245_v30 }
 0x2f2   : > { %2429 = vmatmul.msk.f32.vlgmr.msrb.gmra.mxu0 %vm1145_vm3, %v1247_v33  ;;  %2435 = vmatmul.msk.f32.vlgmr.msrb.gmra.mxu3 %vm1145_vm3, %v1358_v0 }
 0x2f6   : > { %v1437_v34 = vpop.permute.xlu1 %1436 }
 0x2f7   : > { %1457 = vmatpush.msra.mxu0 %v1437_v34 }
 0x304   : > { %1523 = vrot.lane.b32.xlu1 %v3048_v31, %s2717_s23 }
 0x35e   : > { %v1401_v38 = vpop.xlane.xlu1 %1400 }
 0x35f   : > { %2566 = vrcp.f32 %v1401_v38  ;;  %v1416_v43 = vand.u32 2147483648, %v1401_v38  ;;  %v1414_v46 = vand.u32 2147483647, %v1401_v38  ;;  %vm1410_vm13 = vweird.f32 %v1401_v38 }
 0x361   : > { %v1417_v48 = vor.u32 1.1754944e-38, %v1416_v43  ;;  %vm1415_vm15 = vcmp.eq.f32.partialorder %v1414_v46, 8.507059e+37 }
 0x365   : > { %v2567_v39 = vpop.eup %2566 }
 0x366   : > { %v1406_v41 = vmul.f32 %v2567_v39, %v1401_v38  ;;  %vm1411_vm12 = vweird.f32 %v2567_v39 }
 0x367   : > { %vm1412_vm14 = vmor %vm1410_vm13, %vm1411_vm12 }
 0x368   : > { %v1407_v42 = vsub.f32 1.0, %v1406_v41 }
 0x36a   : > { %v1408_v45 = vmul.f32 %v2567_v39, %v1407_v42 }
 0x36c   : > { %v1409_v47 = vadd.f32 %v2567_v39, %v1408_v45 }
 0x36d   : > { %v1268_v49 = vpop.f32.mrf.mxu3 }
 0x36e   : > { %v1413_v50 = vsel %vm1412_vm14, %v2567_v39, %v1409_v47  ;;  %2430 = vmatmul.msk.f32.vlgmr.msra.gmra.mxu1 %vm1145_vm3, %v1268_v49 }
 0x36f   : > { %v1418_v51 = vsel %vm1415_vm15, %v1417_v48, %v1413_v50  ;;  %v1291_v53 = vpop.f32.mrf.mxu0 }
 0x370   : > { %v1433_v52 = vmul.f32 %v2565_v21, %v1418_v51 }
 0x372   : > { %2436 = vmatmul.msk.f32.vlgmr.msra.gmra.mxu0 %vm1145_vm3, %v1433_v52  ;;  %v1679_v52 = vld [vmem:[%s2957_s25 + $0x10] sm:$0xff] }
 0x375   : > { %v1382_v54 = vpop.f32.mrf.mxu3 }
 0x376   : > { %v1386_v55 = vmul.f32 0.35355338, %v1382_v54  ;;  %v1524_v56 = vpop.permute.xlu1 %1523  ;;  %2431 = vmatmul.msk.f32.gmra.mxu1 %vm1145_vm3, %v1291_v53 }
 0x377   : > { %2440 = vmatpush.xpose.msk.msrb.mxu0 %vm1145_vm3, %v1524_v56 }
 0x378   : > { %v1390_v57 = vsel %vm1145_vm3, %v1386_v55, -inf }
 0x379   : > { %1391 = vmax.xlane.f32.xlu0 %v1390_v57 }
 0x37a   : > { %2441 = vmatmul.msk.f32.vlgmr.msrb.gmra.mxu0 %vm1145_vm3, %v1522_v58 }
 0x38d   : > { %1463 = vrot.lane.b32.xlu0 %v3083_v44, %s2716_s5 }
 0x395   : > { %1713 = vrot.lane.b32.xlu0 %v3048_v31, %s2718_s1 }
 0x3eb   : > { %v3134_v30 = vpop.f32.mrf.mxu1 }
 0x3ec   : > { %v1392_v60 = vpop.xlane.xlu0 %1391 }
 0x3ed   : > { %v1394_v61 = vsub.f32 %v1386_v55, %v1392_v60 }
 0x3ef   : > { %v1397_v62 = vmul.f32 1.442695, %v1394_v61  ;;  %v1459_v63 = vpop.f32.mrf.mxu0 }
 0x3f0   : > { %2438 = vmatmul.msk.f32.vlgmr.msra.gmra.mxu3 %vm1145_vm3, %v1459_v63 }
 0x3f1   : > { %2568 = vpow2.f32 %v1397_v62 }
 0x3f3   : > { %v3136_v45 = vpop.f32.mrf.mxu1 }
 0x3f7   : > { %v2569_v0 = vpop.eup %2568  ;;  %v1546_v1 = vpop.f32.mrf.mxu0 }
 0x3f8   : > { %v1577_v2 = vmul.f32 0.35355338, %v1546_v1  ;;  %v1402_v3 = vsel %vm1145_vm3, %v2569_v0, 0.0 }
 0x3f9   : > { %1403 = vadd.xlane.f32.xlu1 %v1402_v3 }
 0x3fa   : > { %v1579_v4 = vsel %vm1145_vm3, %v1577_v2, -inf }
 0x3fb   : > { %1580 = vmax.xlane.f32.xlu2 %v1579_v4 }
 0x3ff   : > { %v1464_v5 = vpop.permute.xlu0 %1463 }
 0x400   : > { %1484 = vmatpush.msrb.mxu2 %v1464_v5 }
 0x407   : > { %v1714_v24 = vpop.permute.xlu0 %1713 }
 0x412   : > { %1627 = vrot.lane.b32.xlu1 %v3078_v40, %s2717_s23 }
 0x413   : > { %1551 = vrot.lane.b32.xlu2 %v3058_v35, %s2717_s23 }
 0x41a   : > { %1549 = vrot.lane.b32.xlu1 %v3060_v36, %s2717_s23 }
 0x41b   : > { %1711 = vrot.lane.b32.xlu2 %v3050_v32, %s2718_s1 }
 0x422   : > { %1741 = vrot.lane.b32.xlu1 %v3058_v35, %s2718_s1 }
 0x46c   : > { %v1404_v31 = vpop.xlane.xlu1 %1403 }
 0x46d   : > { %2570 = vrcp.f32 %v1404_v31  ;;  %v1430_v13 = vand.u32 2147483648, %v1404_v31  ;;  %v1428_v15 = vand.u32 2147483647, %v1404_v31  ;;  %vm1424_vm1 = vweird.f32 %v1404_v31 }
 0x46e   : > { %v1581_v6 = vpop.xlane.xlu2 %1580 }
 0x46f   : > { %v1585_v7 = vsub.f32 %v1577_v2, %v1581_v6  ;;  %v1431_v17 = vor.u32 1.1754944e-38, %v1430_v13  ;;  %vm1429_vm5 = vcmp.eq.f32.partialorder %v1428_v15, 8.507059e+37 }
 0x471   : > { %v1587_v8 = vmul.f32 1.442695, %v1585_v7 }
 0x473   : > { %v2571_v9 = vpop.eup %2570  ;;  %2572 = vpow2.f32 %v1587_v8  ;;  %v3144_v53 = vpop.f32.mrf.mxu3 }
 0x474   : > { %v1420_v10 = vmul.f32 %v2571_v9, %v1404_v31  ;;  %vm1425_vm0 = vweird.f32 %v2571_v9 }
 0x475   : > { %vm1426_vm4 = vmor %vm1424_vm1, %vm1425_vm0 }
 0x476   : > { %v1421_v11 = vsub.f32 1.0, %v1420_v10  ;;  %v1552_v12 = vpop.permute.xlu2 %1551 }
 0x477   : > { %2442 = vmatpush.xpose.msk.msrb.mxu1 %vm1145_vm3, %v1552_v12 }
 0x478   : > { %v1422_v14 = vmul.f32 %v2571_v9, %v1421_v11 }
 0x479   : > { %v2573_v32 = vpop.eup %2572 }
 0x47a   : > { %v1423_v16 = vadd.f32 %v2571_v9, %v1422_v14  ;;  %v1591_v35 = vsel %vm1145_vm3, %v2573_v32, 0.0 }
 0x47b   : > { %1592 = vadd.xlane.f32.xlu0 %v1591_v35  ;;  %1701 = vmatpush.msra.mxu1 %v1679_v52 }
 0x47c   : > { %v1427_v18 = vsel %vm1426_vm4, %v2571_v9, %v1423_v16 }
 0x47d   : > { %v1432_v20 = vsel %vm1429_vm5, %v1431_v17, %v1427_v18 }
 0x47e   : > { %v1434_v21 = vmul.f32 %v2569_v0, %v1432_v20  ;;  %v1712_v47 = vpop.permute.xlu2 %1711 }
 0x480   : > { %2437 = vmatmul.msk.f32.vlgmr.msrb.gmra.mxu2 %vm1145_vm3, %v1434_v21 }
 0x484   : > { %v1628_v23 = vpop.permute.xlu1 %1627 }
 0x485   : > { %1648 = vmatpush.msra.mxu2 %v1628_v23 }
 0x487   : > { %2448 = vmatpush.xpose.msk.msrb.mxu2 %vm1145_vm3, %v1714_v24 }
 0x48c   : > { %v1550_v25 = vpop.permute.xlu1 %1549 }
 0x48d   : > { %2443 = vmatmul.msk.f32.vlgmr.msrb.gmra.mxu1 %vm1145_vm3, %v1550_v25  ;;  %v2541_v25 = vpack.i.bf16 %v3083_v44, %v3078_v40 }
 0x48f   : > { %1739 = vrot.lane.b32.xlu0 %v3060_v36, %s2718_s1 }
 0x494   : > { %v1742_v26 = vpop.permute.xlu1 %1741 }
 0x495   : > { %2450 = vmatpush.xpose.msk.msrb.mxu3 %vm1145_vm3, %v1742_v26  ;;  %v1869_v26 = vld [vmem:[%s2957_s25 + $0x18] sm:$0xff] }
 0x499   : > { %1891 = vmatpush.msra.mxu3 %v1869_v26 }
 0x4ee   : > { %v1593_v27 = vpop.xlane.xlu0 %1592 }
 0x4ef   : > { %2574 = vrcp.f32 %v1593_v27  ;;  %v1608_v34 = vand.u32 2147483648, %v1593_v27  ;;  %v1606_v38 = vand.u32 2147483647, %v1593_v27  ;;  %vm1602_vm7 = vweird.f32 %v1593_v27 }
 0x4f1   : > { %v1609_v41 = vor.u32 1.1754944e-38, %v1608_v34  ;;  %vm1607_vm9 = vcmp.eq.f32.partialorder %v1606_v38, 8.507059e+37 }
 0x4f5   : > { %v2575_v28 = vpop.eup %2574 }
 0x4f6   : > { %v1598_v29 = vmul.f32 %v2575_v28, %v1593_v27  ;;  %vm1603_vm6 = vweird.f32 %v2575_v28 }
 0x4f7   : > { %vm1604_vm8 = vmor %vm1602_vm7, %vm1603_vm6 }
 0x4f8   : > { %v1599_v33 = vsub.f32 1.0, %v1598_v29 }
 0x4fa   : > { %v1600_v37 = vmul.f32 %v2575_v28, %v1599_v33 }
 0x4fc   : > { %v1601_v39 = vadd.f32 %v2575_v28, %v1600_v37 }
 0x4fe   : > { %v1605_v42 = vsel %vm1604_vm8, %v2575_v28, %v1601_v39 }
 0x4ff   : > { %v1610_v36 = vsel %vm1607_vm9, %v1609_v41, %v1605_v42 }
 0x500   : > { %v1625_v43 = vmul.f32 %v2573_v32, %v1610_v36 }
 0x501   : > { %v1740_v49 = vpop.permute.xlu0 %1739 }
 0x502   : > { %2444 = vmatmul.msk.f32.vlgmr.msra.gmra.mxu2 %vm1145_vm3, %v1625_v43 }
 0x503   : > { %v1486_v46 = vpop.f32.mrf.mxu2 }
 0x504   : > { %2439 = vmatmul.msk.f32.gmra.mxu3 %vm1145_vm3, %v1486_v46 }
 0x50a   : > { %v1574_v48 = vpop.f32.mrf.mxu1  ;;  %2449 = vmatmul.msk.f32.vlgmr.msrb.gmra.mxu2 %vm1145_vm3, %v1712_v47 }
 0x50b   : > { %v1578_v50 = vmul.f32 0.35355338, %v1574_v48 }
 0x50c   : > { %2451 = vmatmul.msk.f32.vlgmr.msrb.gmra.mxu3 %vm1145_vm3, %v1740_v49 }
 0x50d   : > { %v1582_v51 = vsel %vm1145_vm3, %v1578_v50, -inf }
 0x50e   : > { %1583 = vmax.xlane.f32.xlu1 %v1582_v51 }
 0x581   : > { %v1584_v54 = vpop.xlane.xlu1 %1583 }
 0x582   : > { %v1586_v55 = vsub.f32 %v1578_v50, %v1584_v54 }
 0x584   : > { %v1589_v56 = vmul.f32 1.442695, %v1586_v55 }
 0x585   : > { %v1650_v57 = vpop.f32.mrf.mxu2 }
 0x586   : > { %2576 = vpow2.f32 %v1589_v56  ;;  %2446 = vmatmul.msk.f32.vlgmr.msra.gmra.mxu1 %vm1145_vm3, %v1650_v57 }
 0x587   : > { %v3147_v58 = vpop.f32.mrf.mxu3 }
 0x58c   : > { %v2577_v59 = vpop.eup %2576 }
 0x58d   : > { %v1736_v60 = vpop.f32.mrf.mxu2  ;;  %v1594_v61 = vsel %vm1145_vm3, %v2577_v59, 0.0 }
 0x58e   : > { %v1767_v62 = vmul.f32 0.35355338, %v1736_v60  ;;  %1595 = vadd.xlane.f32.xlu1 %v1594_v61 }
 0x58f   : > { %v1764_v63 = vpop.f32.mrf.mxu3 }
 0x590   : > { %v1768_v0 = vmul.f32 0.35355338, %v1764_v63  ;;  %v1769_v1 = vsel %vm1145_vm3, %v1767_v62, -inf }
 0x591   : > { %1770 = vmax.xlane.f32.xlu2 %v1769_v1 }
 0x592   : > { %v1772_v2 = vsel %vm1145_vm3, %v1768_v0, -inf }
 0x593   : > { %1773 = vmax.xlane.f32.xlu0 %v1772_v2 }
 0x5a7   : > { %1653 = vrot.lane.b32.xlu1 %v3083_v44, %s2717_s23 }
 0x601   : > { %v1596_v3 = vpop.xlane.xlu1 %1595 }
 0x602   : > { %2578 = vrcp.f32 %v1596_v3  ;;  %v1622_v15 = vand.u32 2147483648, %v1596_v3  ;;  %vm1616_vm11 = vweird.f32 %v1596_v3  ;;  %v1620_v35 = vand.u32 2147483647, %v1596_v3 }
 0x603   : > { %v1703_v2 = vpop.f32.mrf.mxu1 }
 0x604   : > { %v1771_v4 = vpop.xlane.xlu2 %1770  ;;  %v1623_v20 = vor.u32 1.1754944e-38, %v1622_v15  ;;  %vm1621_vm13 = vcmp.eq.f32.partialorder %v1620_v35, 8.507059e+37 }
 0x605   : > { %v1775_v5 = vsub.f32 %v1767_v62, %v1771_v4 }
 0x606   : > { %v1774_v31 = vpop.xlane.xlu0 %1773 }
 0x607   : > { %v1777_v6 = vmul.f32 1.442695, %v1775_v5  ;;  %v1776_v7 = vsub.f32 %v1768_v0, %v1774_v31  ;;  %v2549_v0 = vld [vmem:[%s3361_s29] ss:$0 sm:$0xff] }
 0x608   : > { %v2579_v8 = vpop.eup %2578  ;;  %v1327_v1 = vadd.f32 %v2549_v0, %v3134_v30 }
 0x609   : > { %v1612_v9 = vmul.f32 %v2579_v8, %v1596_v3  ;;  %2580 = vpow2.f32 %v1777_v6  ;;  %v1779_v10 = vmul.f32 1.442695, %v1776_v7  ;;  %vm1617_vm10 = vweird.f32 %v2579_v8 }
 0x60a   : > { %vm1618_vm12 = vmor %vm1616_vm11, %vm1617_vm10  ;;  %v1519_v3 = vadd.f32 %v3144_v53, %v1327_v1  ;;  %v1328_v6 = vadd.f32 %v2549_v0, %v3136_v45 }
 0x60b   : > { %v1613_v11 = vsub.f32 1.0, %v1612_v9  ;;  %2582 = vpow2.f32 %v1779_v10 }
 0x60c   : > { %v1709_v4 = vadd.f32 %v1703_v2, %v1519_v3  ;;  %v1520_v9 = vadd.f32 %v3147_v58, %v1328_v6  ;;  %v2010_v3 = vld [vmem:[%s2984_s22 + $0x28] sm:$0xff] }
 0x60d   : > { %v1614_v12 = vmul.f32 %v2579_v8, %v1613_v11 }
 0x60f   : > { %v2581_v13 = vpop.eup %2580  ;;  %v1615_v14 = vadd.f32 %v2579_v8, %v1614_v12 }
 0x610   : > { %v1781_v32 = vsel %vm1145_vm3, %v2581_v13, 0.0 }
 0x611   : > { %v2583_v16 = vpop.eup %2582  ;;  %1782 = vadd.xlane.f32.xlu2 %v1781_v32  ;;  %v1619_v18 = vsel %vm1618_vm12, %v2579_v8, %v1615_v14  ;;  %v2719_v14 = vmov 32.0  }
 0x612   : > { %v1784_v17 = vsel %vm1145_vm3, %v2583_v16, 0.0  ;;  %v1624_v21 = vsel %vm1621_vm13, %v1623_v20, %v1619_v18 }
 0x613   : > { %1785 = vadd.xlane.f32.xlu0 %v1784_v17  ;;  %v1626_v24 = vmul.f32 %v2577_v59, %v1624_v21 }
 0x619   : > { %v1654_v23 = vpop.permute.xlu1 %1653 }
 0x61a   : > { %1674 = vmatpush.msra.mxu0 %v1654_v23 }
 0x61b   : > { %2445 = vmatmul.msk.f32.vlgmr.msra.gmra.mxu0 %vm1145_vm3, %v1626_v24 }
 0x629   : > { %2542 = vrot.lane.b32.xlu2 %v2541_v25, %s2718_s1 }
 0x684   : > { %v1783_v27 = vpop.xlane.xlu2 %1782 }
 0x685   : > { %2584 = vrcp.f32 %v1783_v27  ;;  %v1798_v36 = vand.u32 2147483648, %v1783_v27  ;;  %v1796_v44 = vand.u32 2147483647, %v1783_v27  ;;  %vm1792_vm15 = vweird.f32 %v1783_v27 }
 0x686   : > { %v1786_v28 = vpop.xlane.xlu0 %1785 }
 0x687   : > { %2586 = vrcp.f32 %v1786_v28  ;;  %v1812_v46 = vand.u32 2147483648, %v1786_v28  ;;  %v1810_v49 = vand.u32 2147483647, %v1786_v28  ;;  %v1799_v50 = vor.u32 1.1754944e-38, %v1798_v36 }
 0x688   : > { %vm1797_vm4 = vcmp.eq.f32.partialorder %v1796_v44, 8.507059e+37  ;;  %vm1806_vm5 = vweird.f32 %v1786_v28  ;;  %2588 = vrcp.f32 %v2719_v14  ;;  %v2017_v44 = vld [vmem:[%s2984_s22 + $0x60] sm:$0xff] }
 0x689   : > { %v1813_v55 = vor.u32 1.1754944e-38, %v1812_v46  ;;  %vm1811_vm7 = vcmp.eq.f32.partialorder %v1810_v49, 8.507059e+37  ;;  %v2015_v49 = vld [vmem:[%s2984_s22 + $0x50] sm:$0xff]  ;;  %v2005_v14 = vld [vmem:[%s2984_s22] sm:$0xff] }
 0x68b   : > { %v2585_v29 = vpop.eup %2584 }
 0x68c   : > { %v1788_v33 = vmul.f32 %v2585_v29, %v1783_v27  ;;  %v2543_v34 = vpop.permute.xlu2 %2542  ;;  %vm1793_vm14 = vweird.f32 %v2585_v29  ;;  %v1969_v27 = vld [vmem:[%s2970_s8 + $0x18] sm:$0xff] }
 0x68d   : > { %v2587_v37 = vpop.eup %2586  ;;  %v2545_v38 = vunpack.i.h.bf16 %v2543_v34  ;;  %v2544_v39 = vunpack.i.l.bf16 %v2543_v34  ;;  %vm1794_vm1 = vmor %vm1792_vm15, %vm1793_vm14 }
 0x68e   : > { %v1789_v41 = vsub.f32 1.0, %v1788_v33  ;;  %v1802_v42 = vmul.f32 %v2587_v37, %v1786_v28  ;;  %vm1807_vm0 = vweird.f32 %v2587_v37  ;;  %v2589_v15 = vpop.eup %2588  ;;  %v1968_v28 = vld [vmem:[%s2970_s8 + $0x10] sm:$0xff]  ;;  %v1966_v33 = vld [vmem:[%s2970_s8] sm:$0xff] }
 0x68f   : > { %1838 = vmatpush.msrb.mxu0 %v2544_v39  ;;  %1864 = vmatpush.msra.mxu2 %v2545_v38  ;;  %vm1808_vm6 = vmor %vm1806_vm5, %vm1807_vm0  ;;  %v1912_v45 = vmul.f32 32.0, %v2589_v15  ;;  %v2020_v39 = vld [vmem:[%s2984_s22 + $0x78] sm:$0xff] }
 0x690   : > { %v1790_v40 = vmul.f32 %v2585_v29, %v1789_v41  ;;  %v1803_v43 = vsub.f32 1.0, %v1802_v42  ;;  %v2019_v41 = vld [vmem:[%s2984_s22 + $0x70] sm:$0xff]  ;;  %2025 = vmatpush.msrb.mxu1 %v2020_v39  ;;  %v2018_v42 = vld [vmem:[%s2984_s22 + $0x68] sm:$0xff] }
 0x691   : > { %v1913_v32 = vsub.f32 1.0, %v1912_v45  ;;  %1992 = vmatpush.msra.mxu0 %v1969_v27 }
 0x692   : > { %v1791_v47 = vadd.f32 %v2585_v29, %v1790_v40  ;;  %v1804_v48 = vmul.f32 %v2587_v37, %v1803_v43  ;;  %2026 = vmatpush.msrb.mxu1 %v2019_v41 }
 0x693   : > { %1993 = vmatpush.msra.mxu0 %v1968_v28 }
 0x694   : > { %v1795_v51 = vsel %vm1794_vm1, %v2585_v29, %v1791_v47  ;;  %v1805_v52 = vadd.f32 %v2587_v37, %v1804_v48  ;;  %v1967_v29 = vld [vmem:[%s2970_s8 + $0x8] sm:$0xff]  ;;  %2027 = vmatpush.msrb.mxu1 %v2018_v42  ;;  %v2016_v47 = vld [vmem:[%s2984_s22 + $0x58] sm:$0xff]  ;;  %s3362_s8 = sld [smem:[#allocation16_spill]] }
 0x695   : > { %v1800_v54 = vsel %vm1797_vm4, %v1799_v50, %v1795_v51  ;;  %1994 = vmatpush.msra.mxu0 %v1967_v29  ;;  %v2014_v51 = vld [vmem:[%s2984_s22 + $0x48] sm:$0xff] }
 0x696   : > { %v1809_v56 = vsel %vm1808_vm6, %v2587_v37, %v1805_v52  ;;  %v1815_v57 = vmul.f32 %v2581_v13, %v1800_v54  ;;  %2028 = vmatpush.msrb.mxu1 %v2017_v44  ;;  %v2013_v54 = vld [vmem:[%s2984_s22 + $0x40] sm:$0xff] }
 0x697   : > { %v1814_v59 = vsel %vm1811_vm7, %v1813_v55, %v1809_v56  ;;  %1995 = vmatpush.msra.mxu0 %v1966_v33 }
 0x698   : > { %v1676_v60 = vpop.f32.mrf.mxu0  ;;  %2452 = vmatmul.msk.f32.vlgmr.msrb.gmra.mxu0 %vm1145_vm3, %v1815_v57  ;;  %v1816_v61 = vmul.f32 %v2583_v16, %v1814_v59  ;;  %2029 = vmatpush.msrb.mxu1 %v2016_v47  ;;  %v2012_v57 = vld [vmem:[%s2984_s22 + $0x38] sm:$0xff] }
 0x699   : > { %2447 = vmatmul.msk.f32.gmra.mxu1 %vm1145_vm3, %v1676_v60 }
 0x69a   : > { %2453 = vmatmul.msk.f32.vlgmr.msra.gmra.mxu2 %vm1145_vm3, %v1816_v61  ;;  %2030 = vmatpush.msrb.mxu1 %v2015_v49  ;;  %v2550_v61 = vld [vmem:[%s3364_s3] ss:$0 sm:$0xff]  ;;  %s3369_s3 = sld [smem:[#allocation32_spill]] (!%p2458_p3) }
 0x69b   : > { %v2551_v2 = vld [vmem:[%s3362_s8] ss:$0 sm:$0xff] }
 0x69c   : > { %2031 = vmatpush.msrb.mxu1 %v2014_v51 }
 0x69e   : > { %2032 = vmatpush.msrb.mxu1 %v2013_v54 }
 0x6a0   : > { %2033 = vmatpush.msrb.mxu1 %v2012_v57 }
 0x715   : > { %v1840_v62 = vpop.f32.mrf.mxu0 }
 0x716   : > { %2454 = vmatmul.msk.f32.vlgmr.msra.gmra.mxu3 %vm1145_vm3, %v1840_v62  ;;  %v1706_v8 = vpop.f32.mrf.mxu1  ;;  %v2011_v62 = vld [vmem:[%s2984_s22 + $0x30] sm:$0xff] }
 0x717   : > { %v1710_v11 = vadd.f32 %v1706_v8, %v1520_v9  ;;  %2034 = vmatpush.msrb.mxu1 %v2011_v62  ;;  %v2008_v8 = vld [vmem:[%s2984_s22 + $0x18] sm:$0xff] }
 0x719   : > { %2035 = vmatpush.msrb.mxu1 %v2010_v3 }
 0x71d   : > { %v1866_v63 = vpop.f32.mrf.mxu2 }
 0x71e   : > { %2455 = vmatmul.msk.f32.gmra.mxu3 %vm1145_vm3, %v1866_v63  ;;  %vm1916_vm3 = vweird.f32 %v2589_v15 }
 0x799   : > { %v1893_v5 = vpop.f32.mrf.mxu3 }
 0x79a   : > { %v1899_v31 = vadd.f32 %v1893_v5, %v1709_v4 }
 0x79c   : > { %v1901_v7 = vadd.f32 %v1899_v31, %v3016_v19  ;;  %v1914_v19 = vmul.f32 %v2589_v15, %v1913_v32  ;;  %v2009_v31 = vld [vmem:[%s2984_s22 + $0x20] sm:$0xff] }
 0x79d   : > { %2036 = vmatpush.msrb.mxu1 %v2009_v31 }
 0x79e   : > { %v1905_v10 = vsel %vm1052_vm2, %v1901_v7, 0.0  ;;  %v1915_v16 = vadd.f32 %v2589_v15, %v1914_v19 }
 0x79f   : > { %1906 = vadd.xlane.f32.xlu0 %v1905_v10  ;;  %2037 = vmatpush.msrb.mxu1 %v2008_v8 }
 0x7a0   : > { %v3179_v58 = vsel %vm1916_vm3, %v2589_v15, %v1915_v16  ;;  %v2552_v15 = vld [vmem:[%s975_s26] ss:$0 sm:$0xff] }
 0x7a1   : > { %v1896_v12 = vpop.f32.mrf.mxu3 }
 0x7a2   : > { %v1900_v13 = vadd.f32 %v1896_v12, %v1710_v11 }
 0x7a4   : > { %v1902_v30 = vadd.f32 %v1900_v13, %v3024_v22 }
 0x7a6   : > { %v1908_v53 = vsel %vm1052_vm2, %v1902_v30, 0.0 }
 0x7a7   : > { %1909 = vadd.xlane.f32.xlu0 %v1908_v53  ;;  %v2006_v53 = vld [vmem:[%s2984_s22 + $0x8] sm:$0xff] }
 0x812   : > { %v1907_v35 = vpop.xlane.xlu0 %1906 }
 0x813   : > { %v1918_v17 = vmul.f32 %v3179_v58, %v1907_v35 }
 0x815   : > { %v1920_v22 = vsub.f32 %v1901_v7, %v1918_v17 }
 0x817   : > { %v1922_v18 = vmul.f32 %v1920_v22, %v1920_v22 }
 0x819   : > { %v1924_v20 = vsel %vm1052_vm2, %v1922_v18, 0.0 }
 0x81a   : > { %1925 = vadd.xlane.f32.xlu0 %v1924_v20  ;;  %v1910_v21 = vpop.xlane.xlu0 %1909 }
 0x81b   : > { %v1919_v23 = vmul.f32 %v3179_v58, %v1910_v21 }
 0x81d   : > { %v3184_v24 = vsub.f32 %v1902_v30, %v1919_v23  ;;  %v2007_v30 = vld [vmem:[%s2984_s22 + $0x10] sm:$0xff] }
 0x81e   : > { %2038 = vmatpush.msrb.mxu1 %v2007_v30 }
 0x81f   : > { %v1923_v25 = vmul.f32 %v3184_v24, %v3184_v24 }
 0x820   : > { %2039 = vmatpush.msrb.mxu1 %v2006_v53 }
 0x821   : > { %v1927_v26 = vsel %vm1052_vm2, %v1923_v25, 0.0 }
 0x822   : > { %1928 = vadd.xlane.f32.xlu1 %v1927_v26  ;;  %2040 = vmatpush.msrb.mxu1 %v2005_v14 }
 0x88d   : > { %v1926_v34 = vpop.xlane.xlu0 %1925 }
 0x88e   : > { %v1930_v37 = vmul.f32 %v1926_v34, %v3179_v58 }
 0x890   : > { %v1932_v38 = vadd.f32 1e-05, %v1930_v37 }
 0x892   : > { %2590 = vrsqrt.f32 %v1932_v38  ;;  %vm1940_vm9 = vweird.f32 %v1932_v38 }
 0x895   : > { %v1929_v36 = vpop.xlane.xlu1 %1928 }
 0x896   : > { %v1931_v40 = vmul.f32 %v1929_v36, %v3179_v58 }
 0x898   : > { %v2591_v43 = vpop.eup %2590  ;;  %v1933_v46 = vadd.f32 1e-05, %v1931_v40 }
 0x899   : > { %v1935_v48 = vmul.f32 %v2591_v43, %v1932_v38  ;;  %vm1941_vm8 = vweird.f32 %v2591_v43 }
 0x89a   : > { %2592 = vrsqrt.f32 %v1933_v46  ;;  %vm1942_vm10 = vmor %vm1940_vm9, %vm1941_vm8  ;;  %vm1950_vm12 = vweird.f32 %v1933_v46 }
 0x89b   : > { %v1936_v50 = vmul.f32 %v2591_v43, %v1935_v48 }
 0x89d   : > { %v1937_v52 = vmul.f32 0.5, %v1936_v50 }
 0x89f   : > { %v1938_v55 = vsub.f32 1.5, %v1937_v52 }
 0x8a0   : > { %v2593_v56 = vpop.eup %2592 }
 0x8a1   : > { %v1939_v59 = vmul.f32 %v2591_v43, %v1938_v55  ;;  %v1945_v60 = vmul.f32 %v2593_v56, %v1933_v46  ;;  %vm1951_vm11 = vweird.f32 %v2593_v56 }
 0x8a2   : > { %vm1952_vm13 = vmor %vm1950_vm12, %vm1951_vm11 }
 0x8a3   : > { %v1943_v63 = vsel %vm1942_vm10, %v2591_v43, %v1939_v59  ;;  %v1946_v0 = vmul.f32 %v2593_v56, %v1945_v60  ;;  %v2554_v59 = vld [vmem:[%s986_s30] ss:$0 sm:$0xff]  ;;  %s3367_s30 = sld [smem:[#allocation31_spill]] (!%p2458_p3) }
 0x8a4   : > { %v1954_v1 = vmul.f32 %v1943_v63, %v1920_v22  ;;  %v2553_v22 = vld [vmem:[%s983_s6] ss:$0 sm:$0xff] }
 0x8a5   : > { %v1947_v4 = vmul.f32 0.5, %v1946_v0 }
 0x8a6   : > { %v1959_v5 = vmul.f32 %v2550_v61, %v1954_v1 }
 0x8a7   : > { %v1948_v6 = vsub.f32 1.5, %v1947_v4 }
 0x8a8   : > { %v1964_v7 = vadd.f32 %v2551_v2, %v1959_v5 }
 0x8a9   : > { %v1949_v9 = vmul.f32 %v2593_v56, %v1948_v6  ;;  %s3368_s25 = smov (!%p2458_p3), %s3367_s30 }
 0x8aa   : > { %2456 = vmatmul.msk.f32.vlgmr.msra.gmra.mxu0 %vm1052_vm2, %v1964_v7 }
 0x8ab   : > { %v1953_v10 = vsel %vm1952_vm13, %v2593_v56, %v1949_v9 }
 0x8ac   : > { %v1955_v11 = vmul.f32 %v1953_v10, %v3184_v24 }
 0x8ae   : > { %v1960_v12 = vmul.f32 %v2550_v61, %v1955_v11  ;;  %v2555_v61 = vld [vmem:[%s989_s12] ss:$0 sm:$0xff] }
 0x8b0   : > { %v1965_v13 = vadd.f32 %v2551_v2, %v1960_v12 }
 0x8b2   : > { %2457 = vmatmul.msk.f32.gmra.mxu0 %vm1052_vm2, %v1965_v13 }
 0x927   : > { %v1997_v45 = vpop.f32.mrf.mxu0 }
 0x928   : > { %v1998_v32 = vadd.f32 %v2552_v15, %v1997_v45 }
 0x92a   : > { %v2003_v19 = vmax.f32 %v1998_v32, 0.0 }
 0x92c   : > { %2041 = vmatmul.f32.vlgmr.msrb.gmra.mxu1 %v2003_v19 }
 0x92f   : > { %v2000_v16 = vpop.f32.mrf.mxu0 }
 0x930   : > { %v2001_v35 = vadd.f32 %v2552_v15, %v2000_v16 }
 0x932   : > { %v2004_v17 = vmax.f32 %v2001_v35, 0.0 }
 0x934   : > { %2044 = vmatmul.f32.gmra.mxu1 %v2004_v17 }
 0x9a9   : > { %v2042_v18 = vpop.f32.mrf.mxu1 }
 0x9aa   : > { %v2043_v20 = vadd.f32 %v2553_v22, %v2042_v18 }
 0x9ac   : > { %v2048_v21 = vadd.f32 %v2043_v20, %v1964_v7 }
 0x9ae   : > { %v2052_v23 = vsel %vm1052_vm2, %v2048_v21, 0.0 }
 0x9af   : > { %2053 = vadd.xlane.f32.xlu2 %v2052_v23 }
 0x9b1   : > { %v2045_v24 = vpop.f32.mrf.mxu1 }
 0x9b2   : > { %v2046_v25 = vadd.f32 %v2553_v22, %v2045_v24 }
 0x9b4   : > { %v2049_v26 = vadd.f32 %v2046_v25, %v1965_v13 }
 0x9b6   : > { %v2055_v27 = vsel %vm1052_vm2, %v2049_v26, 0.0 }
 0x9b7   : > { %2056 = vadd.xlane.f32.xlu0 %v2055_v27 }
 0xa22   : > { %v2054_v28 = vpop.xlane.xlu2 %2053 }
 0xa23   : > { %v2058_v29 = vmul.f32 %v2054_v28, %v3179_v58 }
 0xa25   : > { %v2060_v33 = vsub.f32 %v2048_v21, %v2058_v29 }
 0xa27   : > { %v2062_v34 = vmul.f32 %v2060_v33, %v2060_v33 }
 0xa29   : > { %v2064_v37 = vsel %vm1052_vm2, %v2062_v34, 0.0 }
 0xa2a   : > { %v2057_v38 = vpop.xlane.xlu0 %2056  ;;  %2065 = vadd.xlane.f32.xlu0 %v2064_v37 }
 0xa2b   : > { %v2059_v39 = vmul.f32 %v2057_v38, %v3179_v58 }
 0xa2d   : > { %v2061_v41 = vsub.f32 %v2049_v26, %v2059_v39 }
 0xa2f   : > { %v2063_v42 = vmul.f32 %v2061_v41, %v2061_v41 }
 0xa31   : > { %v2067_v36 = vsel %vm1052_vm2, %v2063_v42, 0.0 }
 0xa32   : > { %2068 = vadd.xlane.f32.xlu0 %v2067_v36 }
 0xa9d   : > { %v2066_v40 = vpop.xlane.xlu0 %2065 }
 0xa9e   : > { %v2070_v44 = vmul.f32 %v2066_v40, %v3179_v58 }
 0xaa0   : > { %v2072_v43 = vadd.f32 1e-05, %v2070_v44 }
 0xaa2   : > { %2594 = vrsqrt.f32 %v2072_v43  ;;  %vm2080_vm15 = vweird.f32 %v2072_v43 }
 0xaa5   : > { %v2069_v46 = vpop.xlane.xlu0 %2068 }
 0xaa6   : > { %v2071_v47 = vmul.f32 %v2069_v46, %v3179_v58 }
 0xaa8   : > { %v2595_v48 = vpop.eup %2594  ;;  %v2073_v49 = vadd.f32 1e-05, %v2071_v47 }
 0xaa9   : > { %v2075_v50 = vmul.f32 %v2595_v48, %v2072_v43  ;;  %vm2081_vm14 = vweird.f32 %v2595_v48 }
 0xaaa   : > { %2596 = vrsqrt.f32 %v2073_v49  ;;  %vm2082_vm0 = vmor %vm2080_vm15, %vm2081_vm14  ;;  %vm2090_vm4 = vweird.f32 %v2073_v49 }
 0xaab   : > { %v2076_v51 = vmul.f32 %v2595_v48, %v2075_v50 }
 0xaad   : > { %v2077_v52 = vmul.f32 0.5, %v2076_v51 }
 0xaaf   : > { %v2078_v54 = vsub.f32 1.5, %v2077_v52 }
 0xab0   : > { %v2597_v55 = vpop.eup %2596 }
 0xab1   : > { %v2079_v56 = vmul.f32 %v2595_v48, %v2078_v54  ;;  %v2085_v57 = vmul.f32 %v2597_v55, %v2073_v49  ;;  %vm2091_vm1 = vweird.f32 %v2597_v55 }
 0xab2   : > { %vm2092_vm5 = vmor %vm2090_vm4, %vm2091_vm1 }
 0xab3   : > { %v2083_v58 = vsel %vm2082_vm0, %v2595_v48, %v2079_v56  ;;  %v2086_v60 = vmul.f32 %v2597_v55, %v2085_v57 }
 0xab4   : > { %v2094_v62 = vmul.f32 %v2083_v58, %v2060_v33 }
 0xab5   : > { %v2087_v63 = vmul.f32 0.5, %v2086_v60 }
 0xab6   : > { %v2099_v0 = vmul.f32 %v2554_v59, %v2094_v62 }
 0xab7   : > { %v2088_v1 = vsub.f32 1.5, %v2087_v63 }
 0xab8   : > { %v2104_v2 = vadd.f32 %v2555_v61, %v2099_v0 }
 0xab9   : > { %v2089_v3 = vmul.f32 %v2597_v55, %v2088_v1 }
 0xaba   : > { %2106 = vst.msk [vmem:[#allocation2] sm:$0xff] %vm1052_vm2, %v2104_v2 }
 0xabb   : > { %v2093_v4 = vsel %vm2092_vm5, %v2597_v55, %v2089_v3 }
 0xabc   : > { %v2095_v5 = vmul.f32 %v2093_v4, %v2061_v41 }
 0xabe   : > { %v2100_v31 = vmul.f32 %v2554_v59, %v2095_v5  ;;  %2111 = sbr.rel (%p2458_p3) target bundleno = 2892 (0xb4c), region = 124 }
 0xac0   : > { %v2105_v6 = vadd.f32 %v2555_v61, %v2100_v31 }
 0xac2   : > { %2107 = vst.msk [vmem:[#allocation2 + $0x8] sm:$0xff] %vm1052_vm2, %v2105_v6 }
 0xac3   : > { %v2115_v7 = vld [vmem:[%s3367_s30 + $0x18] sm:$0xff]  ;;  %v2114_v8 = vld [vmem:[%s3368_s25 + $0x10] sm:$0xff]  ;;  %v2122_v9 = vrot.slane %v2104_v2, 7  ;;  %v2123_v10 = vrot.slane %v2105_v6, 6  ;;  %v2113_v11 = vld [vmem:[%s3368_s25 + $0x8] sm:$0xff]  ;;  %vm2124_vm6 = vcmask 1041409  }
 0xac4   : > { %2140 = vmatpush.msra.mxu0 %v2115_v7  ;;  %v2112_v12 = vld [vmem:[%s3368_s25] sm:$0xff]  ;;  %v2598_v30 = vld [vmem:[#allocation3] ss:$0 sm:$0xff]  ;;  %vm2148_vm7 = vcmask 1024  }
 0xac5   : > { %v2125_v13 = vsel %vm2124_vm6, %v2123_v10, %v2122_v9 }
 0xac6   : > { %2141 = vmatpush.msra.mxu0 %v2114_v8 }
 0xac8   : > { %2142 = vmatpush.msra.mxu0 %v2113_v11 }
 0xaca   : > { %2143 = vmatpush.msra.mxu0 %v2112_v12 }
 0xacb   : > { %2459 = vmatmul.msk.f32.vlgmr.msra.gmra.mxu0 %vm1052_vm2, %v2125_v13 }
 0xb48   : > { %v2145_v53 = vpop.f32.mrf.mxu0 }
 0xb49   : > { %v2146_v14 = vadd.f32 %v2598_v30, %v2145_v53 }
 0xb4b   : > { %2149 = vst.msk [vmem:[%s3369_s3] sm:$0x3] %vm2148_vm7, %v2146_v14 }
 0xb4c PF: > { %s3370_s4 = sld [smem:[#allocation13_spill]] }
 0xb4d   : > { %s3371_s29 = sld [smem:[#allocation10_spill]] }
 0xb4e   : > { %s3372_s30 = sld [smem:[#allocation11_spill]] }
 0xb4f   : > { %s3374_s0 = sld [smem:[#allocation12_spill]] }
 0xb50   : > { %s3375_s23 = sld [smem:[#allocation14_spill]] }
 0xb52   : > { %s38_s1 = sadd.s32 1, %s3370_s4   ;;  %s3373_s4 = sld [smem:[#allocation15_spill]] }
 0xb53   : > { %p35_p4 = scmp.ge.s32.totalorder %s38_s1, 4  }
 0xb55   :  { %37 = sbr.rel (!%p35_p4) target bundleno = 22 (0x16), region = 209 }
 0xb5a   :  { %2169 = vsyncpa [#allocation5], 1 }
 0xb5b   :  { %2171 = vsyncpa [#allocation5 + $0x1], 1 }
 0xb5c   :  { %2172 = vsyncpa [#allocation7], 1 }
 0xb5d   :  { %2174 = vsyncpa [#allocation7 + $0x1], 1 }

</bundles_post_ra>
